<compile_context>
chip_gen: v7x
topology: tpu7x:2x2x1
jax: 0.10.0
libtpu: 0.0.40
codegen_flags: <defaults>
</compile_context>

<pallas_src>
import jax
import jax.numpy as jnp
from jax.experimental import pallas as pl
from jax.experimental.pallas import tpu as pltpu


# ---------------------------------------------------------------------------
# Fused kernel: one image per grid step.
# ---------------------------------------------------------------------------
def _downsample_kernel(x_ref, w1_ref, b1_ref, w2_ref, b2_ref, o_ref,
                       pad1_ref, pad2_ref, col1_ref, col2_ref):
    """Fused MaxPool(2) + (Conv3x3 + BN + ReLU) x 2 for one image.

    x_ref  : (1, Hp, 2, Wp, 2*Cin)  input viewed so both pool axes are plain slices
    w1_ref : (9*Cin, Cout)  bf16    conv1 weights (HWIO flattened), BN1 scale folded
    b1_ref : (1, Cout)      f32     conv1 bias with BN1 folded
    w2_ref : (9*Cout, Cout) bf16    conv2 weights, BN2 scale folded
    b2_ref : (1, Cout)      f32
    o_ref  : (1, Hp, Wp, Cout)      output block (unpadded channels)
    pad1_ref / pad2_ref : VMEM zero-bordered halo buffers for the two convs
    col1_ref / col2_ref : VMEM im2col scratch (Hp, Wp, 9*C) for the two convs
    """
    Hp = pad1_ref.shape[0] - 2
    Wp = pad1_ref.shape[1] - 2
    Cin = pad1_ref.shape[2]
    Cout = pad2_ref.shape[2]

    def zero_border(pad_ref):
        # Only the 1-pixel halo frame needs to be zero; interior is overwritten
        # every step.  Kept per-step (cheap) so it is correct even when the
        # batch axis is split across TensorCores (per-core scratch instances).
        c = pad_ref.shape[2]
        zrow = jnp.zeros((1, Wp + 2, c), jnp.float32)
        zcol = jnp.zeros((Hp + 2, 1, c), jnp.float32)
        pad_ref[0:1, :, :] = zrow
        pad_ref[Hp + 1:Hp + 2, :, :] = zrow
        pad_ref[:, 0:1, :] = zcol
        pad_ref[:, Wp + 1:Wp + 2, :] = zcol

    def conv3x3_bn_relu(pad_ref, col_ref, w_ref, b_ref):
        # Gather the 9 shifted taps into the im2col scratch.  K is laid out
        # tap-major so it matches w_hwio.reshape(9*C, Cout) exactly.
        c = pad_ref.shape[2]
        for t in range(9):
            dy, dx = divmod(t, 3)
            col_ref[:, :, t * c:(t + 1) * c] = pad_ref[dy:dy + Hp, dx:dx + Wp, :]
        # Single deep-K matmul on the MXU, bf16 operands, f32 accumulation.
        patches = col_ref[...].reshape(Hp * Wp, 9 * c).astype(jnp.bfloat16)
        acc = jnp.dot(patches, w_ref[...], preferred_element_type=jnp.float32)
        return jnp.maximum(acc + b_ref[...], 0.0)           # (Hp*Wp, Cout) f32

    # ---- MaxPool2d(2): both window axes exposed by the host view, so the pool
    #      is two elementwise maxes (VPU); the input is read exactly once. ----
    top = x_ref[0, :, 0, :, :]                               # rows 2h   -> (Hp, Wp, 2*Cin)
    bot = x_ref[0, :, 1, :, :]                               # rows 2h+1
    v = jnp.maximum(top, bot)
    pooled = jnp.maximum(v[:, :, :Cin], v[:, :, Cin:])       # (Hp, Wp, Cin)

    # ---- conv1 (3x3, pad=1) + folded BN1 + ReLU ------------------------------
    zero_border(pad1_ref)
    pad1_ref[1:Hp + 1, 1:Wp + 1, :] = pooled
    h1 = conv3x3_bn_relu(pad1_ref, col1_ref, w1_ref, b1_ref)  # (Hp*Wp, Cout)

    # ---- conv2 (3x3, pad=1) + folded BN2 + ReLU ------------------------------
    zero_border(pad2_ref)
    pad2_ref[1:Hp + 1, 1:Wp + 1, :] = h1.reshape(Hp, Wp, Cout)
    h2 = conv3x3_bn_relu(pad2_ref, col2_ref, w2_ref, b2_ref)  # (Hp*Wp, Cout)

    o_ref[0] = h2.reshape(Hp, Wp, Cout).astype(o_ref.dtype)


# ---------------------------------------------------------------------------
# Wrapper: NCHW public API, host-side layout glue + BN folding only.
# ---------------------------------------------------------------------------
def downsample_forward(x_nchw, params, eps=1e-5):
    B, Cin, H, W = x_nchw.shape
    Hp, Wp = H // 2, W // 2                                   # MaxPool2d(2) floors odd dims
    Cout = params["w1"].shape[-1]

    # host-side layout glue (one transpose + metadata-only reshape)
    x_nhwc = jnp.transpose(x_nchw, (0, 2, 3, 1))[:, :2 * Hp, :2 * Wp, :]
    x5 = x_nhwc.reshape(B, Hp, 2, Wp, 2 * Cin)                # expose both pool axes

    # fold eval-mode BN into conv weights & bias; weights go to bf16 (MXU-native)
    def fold(w_hwio, conv_bias, bn):
        gamma, beta, mean, var = bn
        c_in = w_hwio.shape[2]
        scale = gamma / jnp.sqrt(var + eps)                               # (Cout,)
        wf = (w_hwio * scale[None, None, None, :]).reshape(9 * c_in, Cout)  # HWIO flat, tap-major K
        bf = (conv_bias - mean) * scale + beta
        return wf.astype(jnp.bfloat16), bf.reshape(1, Cout).astype(jnp.float32)

    w1f, b1f = fold(params["w1"], params["b1"], params["bn1"])
    w2f, b2f = fold(params["w2"], params["b2"], params["bn2"])

    out = pl.pallas_call(
        _downsample_kernel,
        out_shape=jax.ShapeDtypeStruct((B, Hp, Wp, Cout), jnp.float32),
        grid=(B,),
        in_specs=[
            pl.BlockSpec((1, Hp, 2, Wp, 2 * Cin), lambda b: (b, 0, 0, 0, 0)),
            pl.BlockSpec((9 * Cin, Cout), lambda b: (0, 0)),
            pl.BlockSpec((1, Cout), lambda b: (0, 0)),
            pl.BlockSpec((9 * Cout, Cout), lambda b: (0, 0)),
            pl.BlockSpec((1, Cout), lambda b: (0, 0)),
        ],
        out_specs=pl.BlockSpec((1, Hp, Wp, Cout), lambda b: (b, 0, 0, 0)),
        scratch_shapes=[
            pltpu.VMEM((Hp + 2, Wp + 2, Cin), jnp.float32),   # conv1 halo buffer
            pltpu.VMEM((Hp + 2, Wp + 2, Cout), jnp.float32),  # conv2 halo buffer
            pltpu.VMEM((Hp, Wp, 9 * Cin), jnp.float32),       # conv1 im2col scratch
            pltpu.VMEM((Hp, Wp, 9 * Cout), jnp.float32),      # conv2 im2col scratch
        ],
        compiler_params=pltpu.CompilerParams(
            dimension_semantics=("parallel",),
            vmem_limit_bytes=64 * 1024 * 1024,
        ),
    )(x5, w1f, b1f, w2f, b2f)

    return jnp.transpose(out, (0, 3, 1, 2))                   # NHWC -> NCHW


# ---------------------------------------------------------------------------
# Parameter init (deterministic, in-script) and a pure-JAX reference.
# ---------------------------------------------------------------------------
def init_params(key, in_channels, out_channels):
    ks = jax.random.split(key, 6)

    def bn_params(k):
        k1, k2, k3, k4 = jax.random.split(k, 4)
        gamma = 1.0 + 0.1 * jax.random.normal(k1, (out_channels,), jnp.float32)
        beta = 0.1 * jax.random.normal(k2, (out_channels,), jnp.float32)
        mean = 0.1 * jax.random.normal(k3, (out_channels,), jnp.float32)
        var = 1.0 + 0.1 * jax.random.uniform(k4, (out_channels,), jnp.float32)
        return gamma, beta, mean, var

    w1 = 0.1 * jax.random.normal(ks[0], (3, 3, in_channels, out_channels), jnp.float32)
    b1 = 0.1 * jax.random.normal(ks[1], (out_channels,), jnp.float32)
    w2 = 0.1 * jax.random.normal(ks[2], (3, 3, out_channels, out_channels), jnp.float32)
    b2 = 0.1 * jax.random.normal(ks[3], (out_channels,), jnp.float32)
    return dict(w1=w1, b1=b1, bn1=bn_params(ks[4]),
                w2=w2, b2=b2, bn2=bn_params(ks[5]))


def _reference_downsample(x_nchw, params, eps=1e-5):
    """Pure-JAX/XLA reference at HIGHEST precision (eval-mode BN)."""
    B, C, H, W = x_nchw.shape
    x = x_nchw.reshape(B, C, H // 2, 2, W // 2, 2).max(axis=(3, 5))   # MaxPool2d(2)
    x = jnp.transpose(x, (0, 2, 3, 1))                                # NHWC

    def conv_bn_relu(x, w_hwio, b, bn):
        gamma, beta, mean, var = bn
        y = jax.lax.conv_general_dilated(
            x, w_hwio, window_strides=(1, 1), padding="SAME",
            dimension_numbers=("NHWC", "HWIO", "NHWC"),
            precision=jax.lax.Precision.HIGHEST)
        y = y + b[None, None, None, :]
        y = (y - mean) * (gamma / jnp.sqrt(var + eps)) + beta
        return jnp.maximum(y, 0.0)

    x = conv_bn_relu(x, params["w1"], params["b1"], params["bn1"])
    x = conv_bn_relu(x, params["w2"], params["b2"], params["bn2"])
    return jnp.transpose(x, (0, 3, 1, 2))                             # NCHW


if __name__ == "__main__":
    key = jax.random.PRNGKey(0)
    k_x, k_p = jax.random.split(key)

    B, Cin, H, W = 2, 4, 16, 16
    Cout = 8
    x = jax.random.normal(k_x, (B, Cin, H, W), jnp.float32)
    params = init_params(k_p, Cin, Cout)

    y = jax.jit(downsample_forward)(x, params)
    y = jax.block_until_ready(y)

    assert y.shape == (B, Cout, H // 2, W // 2), y.shape
    assert y.dtype == jnp.float32
    assert bool(jnp.all(jnp.isfinite(y)))
    assert bool(jnp.all(y >= 0.0))          # ReLU output

    # cross-check vs. an f32 HIGHEST-precision reference; the kernel feeds the
    # MXU bf16 operands (f32 accumulation), so allow ~bf16-scale absolute error.
    y_ref = jax.block_until_ready(_reference_downsample(x, params))
    max_err = float(jnp.max(jnp.abs(y - y_ref)))
    assert max_err < 1e-1, f"max abs diff vs reference: {max_err}"

    print("KERNEL_OK")
</pallas_src>

<mosaic_0001>
module attributes {stable_mosaic.version = 11 : i64} {
  func.func @_downsample_kernel(%arg0: i32, %arg1: memref<1x8x2x8x8xf32, #tpu.memory_space<vmem>>, %arg2: memref<36x8xbf16, #tpu.memory_space<vmem>>, %arg3: memref<1x8xf32, #tpu.memory_space<vmem>>, %arg4: memref<72x8xbf16, #tpu.memory_space<vmem>>, %arg5: memref<1x8xf32, #tpu.memory_space<vmem>>, %arg6: memref<1x8x8x8xf32, #tpu.memory_space<vmem>>, %arg7: memref<10x10x4xf32, #tpu.memory_space<vmem>>, %arg8: memref<10x10x8xf32, #tpu.memory_space<vmem>>, %arg9: memref<8x8x36xf32, #tpu.memory_space<vmem>>, %arg10: memref<8x8x72xf32, #tpu.memory_space<vmem>>) attributes {dimension_semantics = [#tpu.dimension_semantics<parallel>], iteration_bounds = array<i64: 2>, scalar_prefetch = 0 : i64, scratch_operands = 4 : i64, tpu.core_type = #tpu.core_type<tc>, window_params = [{transform_indices = @transform_0, window_bounds = array<i64: 1, 8, 2, 8, 8>}, {pipeline_mode = #tpu.pipeline_mode<synchronous>, transform_indices = @transform_1, window_bounds = array<i64: 36, 8>}, {pipeline_mode = #tpu.pipeline_mode<synchronous>, transform_indices = @transform_2, window_bounds = array<i64: 1, 8>}, {pipeline_mode = #tpu.pipeline_mode<synchronous>, transform_indices = @transform_3, window_bounds = array<i64: 72, 8>}, {pipeline_mode = #tpu.pipeline_mode<synchronous>, transform_indices = @transform_4, window_bounds = array<i64: 1, 8>}, {transform_indices = @transform_5, window_bounds = array<i64: 1, 8, 8, 8>}]} {
    %c0 = arith.constant 0 : index
    %c0_0 = arith.constant 0 : index
    %c0_1 = arith.constant 0 : index
    %c0_2 = arith.constant 0 : index
    %c0_3 = arith.constant 0 : index
    %0 = vector.load %arg1[%c0, %c0_0, %c0_1, %c0_2, %c0_3] : memref<1x8x2x8x8xf32, #tpu.memory_space<vmem>>, vector<1x8x1x8x8xf32>
    %1 = vector.shape_cast %0 : vector<1x8x1x8x8xf32> to vector<8x8x8xf32>
    %c0_4 = arith.constant 0 : index
    %c0_5 = arith.constant 0 : index
    %c1 = arith.constant 1 : index
    %c0_6 = arith.constant 0 : index
    %c0_7 = arith.constant 0 : index
    %2 = vector.load %arg1[%c0_4, %c0_5, %c1, %c0_6, %c0_7] : memref<1x8x2x8x8xf32, #tpu.memory_space<vmem>>, vector<1x8x1x8x8xf32>
    %3 = vector.shape_cast %2 : vector<1x8x1x8x8xf32> to vector<8x8x8xf32>
    %4 = arith.maximumf %1, %3 : vector<8x8x8xf32>
    %5 = vector.extract_strided_slice %4 {offsets = [0, 0, 0], sizes = [8, 8, 4], strides = [1, 1, 1]} : vector<8x8x8xf32> to vector<8x8x4xf32>
    %6 = vector.extract_strided_slice %4 {offsets = [0, 0, 4], sizes = [8, 8, 4], strides = [1, 1, 1]} : vector<8x8x8xf32> to vector<8x8x4xf32>
    %7 = arith.maximumf %5, %6 : vector<8x8x4xf32>
    %cst = arith.constant 0.000000e+00 : f32
    %8 = vector.broadcast %cst : f32 to vector<1x10x4xf32>
    %cst_8 = arith.constant 0.000000e+00 : f32
    %9 = vector.broadcast %cst_8 : f32 to vector<10x1x4xf32>
    %c0_9 = arith.constant 0 : index
    %c0_10 = arith.constant 0 : index
    %c0_11 = arith.constant 0 : index
    %10 = vector.load %arg7[%c0_9, %c0_10, %c0_11] : memref<10x10x4xf32, #tpu.memory_space<vmem>>, vector<1x10x4xf32>
    tpu.vector_store %arg7[%c0_9, %c0_10, %c0_11], %8 {strides = array<i32>} : memref<10x10x4xf32, #tpu.memory_space<vmem>>, vector<1x10x4xf32>,
    %c9 = arith.constant 9 : index
    %c0_12 = arith.constant 0 : index
    %c0_13 = arith.constant 0 : index
    %11 = vector.load %arg7[%c9, %c0_12, %c0_13] : memref<10x10x4xf32, #tpu.memory_space<vmem>>, vector<1x10x4xf32>
    tpu.vector_store %arg7[%c9, %c0_12, %c0_13], %8 {strides = array<i32>} : memref<10x10x4xf32, #tpu.memory_space<vmem>>, vector<1x10x4xf32>,
    %c0_14 = arith.constant 0 : index
    %c0_15 = arith.constant 0 : index
    %c0_16 = arith.constant 0 : index
    %12 = vector.load %arg7[%c0_14, %c0_15, %c0_16] : memref<10x10x4xf32, #tpu.memory_space<vmem>>, vector<10x1x4xf32>
    tpu.vector_store %arg7[%c0_14, %c0_15, %c0_16], %9 {strides = array<i32>} : memref<10x10x4xf32, #tpu.memory_space<vmem>>, vector<10x1x4xf32>,
    %c0_17 = arith.constant 0 : index
    %c9_18 = arith.constant 9 : index
    %c0_19 = arith.constant 0 : index
    %13 = vector.load %arg7[%c0_17, %c9_18, %c0_19] : memref<10x10x4xf32, #tpu.memory_space<vmem>>, vector<10x1x4xf32>
    tpu.vector_store %arg7[%c0_17, %c9_18, %c0_19], %9 {strides = array<i32>} : memref<10x10x4xf32, #tpu.memory_space<vmem>>, vector<10x1x4xf32>,
    %c1_20 = arith.constant 1 : index
    %c1_21 = arith.constant 1 : index
    %c0_22 = arith.constant 0 : index
    %14 = vector.load %arg7[%c1_20, %c1_21, %c0_22] : memref<10x10x4xf32, #tpu.memory_space<vmem>>, vector<8x8x4xf32>
    tpu.vector_store %arg7[%c1_20, %c1_21, %c0_22], %7 {strides = array<i32>} : memref<10x10x4xf32, #tpu.memory_space<vmem>>, vector<8x8x4xf32>,
    %c0_23 = arith.constant 0 : index
    %c0_24 = arith.constant 0 : index
    %c0_25 = arith.constant 0 : index
    %15 = vector.load %arg7[%c0_23, %c0_24, %c0_25] : memref<10x10x4xf32, #tpu.memory_space<vmem>>, vector<8x8x4xf32>
    %c0_26 = arith.constant 0 : index
    %c0_27 = arith.constant 0 : index
    %c0_28 = arith.constant 0 : index
    %16 = vector.load %arg9[%c0_26, %c0_27, %c0_28] : memref<8x8x36xf32, #tpu.memory_space<vmem>>, vector<8x8x4xf32>
    tpu.vector_store %arg9[%c0_26, %c0_27, %c0_28], %15 {strides = array<i32>} : memref<8x8x36xf32, #tpu.memory_space<vmem>>, vector<8x8x4xf32>,
    %c0_29 = arith.constant 0 : index
    %c1_30 = arith.constant 1 : index
    %c0_31 = arith.constant 0 : index
    %17 = vector.load %arg7[%c0_29, %c1_30, %c0_31] : memref<10x10x4xf32, #tpu.memory_space<vmem>>, vector<8x8x4xf32>
    %c0_32 = arith.constant 0 : index
    %c0_33 = arith.constant 0 : index
    %c4 = arith.constant 4 : index
    %18 = vector.load %arg9[%c0_32, %c0_33, %c4] : memref<8x8x36xf32, #tpu.memory_space<vmem>>, vector<8x8x4xf32>
    tpu.vector_store %arg9[%c0_32, %c0_33, %c4], %17 {strides = array<i32>} : memref<8x8x36xf32, #tpu.memory_space<vmem>>, vector<8x8x4xf32>,
    %c0_34 = arith.constant 0 : index
    %c2 = arith.constant 2 : index
    %c0_35 = arith.constant 0 : index
    %19 = vector.load %arg7[%c0_34, %c2, %c0_35] : memref<10x10x4xf32, #tpu.memory_space<vmem>>, vector<8x8x4xf32>
    %c0_36 = arith.constant 0 : index
    %c0_37 = arith.constant 0 : index
    %c8 = arith.constant 8 : index
    %20 = vector.load %arg9[%c0_36, %c0_37, %c8] : memref<8x8x36xf32, #tpu.memory_space<vmem>>, vector<8x8x4xf32>
    tpu.vector_store %arg9[%c0_36, %c0_37, %c8], %19 {strides = array<i32>} : memref<8x8x36xf32, #tpu.memory_space<vmem>>, vector<8x8x4xf32>,
    %c1_38 = arith.constant 1 : index
    %c0_39 = arith.constant 0 : index
    %c0_40 = arith.constant 0 : index
    %21 = vector.load %arg7[%c1_38, %c0_39, %c0_40] : memref<10x10x4xf32, #tpu.memory_space<vmem>>, vector<8x8x4xf32>
    %c0_41 = arith.constant 0 : index
    %c0_42 = arith.constant 0 : index
    %c12 = arith.constant 12 : index
    %22 = vector.load %arg9[%c0_41, %c0_42, %c12] : memref<8x8x36xf32, #tpu.memory_space<vmem>>, vector<8x8x4xf32>
    tpu.vector_store %arg9[%c0_41, %c0_42, %c12], %21 {strides = array<i32>} : memref<8x8x36xf32, #tpu.memory_space<vmem>>, vector<8x8x4xf32>,
    %c1_43 = arith.constant 1 : index
    %c1_44 = arith.constant 1 : index
    %c0_45 = arith.constant 0 : index
    %23 = vector.load %arg7[%c1_43, %c1_44, %c0_45] : memref<10x10x4xf32, #tpu.memory_space<vmem>>, vector<8x8x4xf32>
    %c0_46 = arith.constant 0 : index
    %c0_47 = arith.constant 0 : index
    %c16 = arith.constant 16 : index
    %24 = vector.load %arg9[%c0_46, %c0_47, %c16] : memref<8x8x36xf32, #tpu.memory_space<vmem>>, vector<8x8x4xf32>
    tpu.vector_store %arg9[%c0_46, %c0_47, %c16], %23 {strides = array<i32>} : memref<8x8x36xf32, #tpu.memory_space<vmem>>, vector<8x8x4xf32>,
    %c1_48 = arith.constant 1 : index
    %c2_49 = arith.constant 2 : index
    %c0_50 = arith.constant 0 : index
    %25 = vector.load %arg7[%c1_48, %c2_49, %c0_50] : memref<10x10x4xf32, #tpu.memory_space<vmem>>, vector<8x8x4xf32>
    %c0_51 = arith.constant 0 : index
    %c0_52 = arith.constant 0 : index
    %c20 = arith.constant 20 : index
    %26 = vector.load %arg9[%c0_51, %c0_52, %c20] : memref<8x8x36xf32, #tpu.memory_space<vmem>>, vector<8x8x4xf32>
    tpu.vector_store %arg9[%c0_51, %c0_52, %c20], %25 {strides = array<i32>} : memref<8x8x36xf32, #tpu.memory_space<vmem>>, vector<8x8x4xf32>,
    %c2_53 = arith.constant 2 : index
    %c0_54 = arith.constant 0 : index
    %c0_55 = arith.constant 0 : index
    %27 = vector.load %arg7[%c2_53, %c0_54, %c0_55] : memref<10x10x4xf32, #tpu.memory_space<vmem>>, vector<8x8x4xf32>
    %c0_56 = arith.constant 0 : index
    %c0_57 = arith.constant 0 : index
    %c24 = arith.constant 24 : index
    %28 = vector.load %arg9[%c0_56, %c0_57, %c24] : memref<8x8x36xf32, #tpu.memory_space<vmem>>, vector<8x8x4xf32>
    tpu.vector_store %arg9[%c0_56, %c0_57, %c24], %27 {strides = array<i32>} : memref<8x8x36xf32, #tpu.memory_space<vmem>>, vector<8x8x4xf32>,
    %c2_58 = arith.constant 2 : index
    %c1_59 = arith.constant 1 : index
    %c0_60 = arith.constant 0 : index
    %29 = vector.load %arg7[%c2_58, %c1_59, %c0_60] : memref<10x10x4xf32, #tpu.memory_space<vmem>>, vector<8x8x4xf32>
    %c0_61 = arith.constant 0 : index
    %c0_62 = arith.constant 0 : index
    %c28 = arith.constant 28 : index
    %30 = vector.load %arg9[%c0_61, %c0_62, %c28] : memref<8x8x36xf32, #tpu.memory_space<vmem>>, vector<8x8x4xf32>
    tpu.vector_store %arg9[%c0_61, %c0_62, %c28], %29 {strides = array<i32>} : memref<8x8x36xf32, #tpu.memory_space<vmem>>, vector<8x8x4xf32>,
    %c2_63 = arith.constant 2 : index
    %c2_64 = arith.constant 2 : index
    %c0_65 = arith.constant 0 : index
    %31 = vector.load %arg7[%c2_63, %c2_64, %c0_65] : memref<10x10x4xf32, #tpu.memory_space<vmem>>, vector<8x8x4xf32>
    %c0_66 = arith.constant 0 : index
    %c0_67 = arith.constant 0 : index
    %c32 = arith.constant 32 : index
    %32 = vector.load %arg9[%c0_66, %c0_67, %c32] : memref<8x8x36xf32, #tpu.memory_space<vmem>>, vector<8x8x4xf32>
    tpu.vector_store %arg9[%c0_66, %c0_67, %c32], %31 {strides = array<i32>} : memref<8x8x36xf32, #tpu.memory_space<vmem>>, vector<8x8x4xf32>,
    %c0_68 = arith.constant 0 : index
    %c0_69 = arith.constant 0 : index
    %c0_70 = arith.constant 0 : index
    %33 = vector.load %arg9[%c0_68, %c0_69, %c0_70] : memref<8x8x36xf32, #tpu.memory_space<vmem>>, vector<8x8x36xf32>
    %34 = vector.shape_cast %33 : vector<8x8x36xf32> to vector<64x36xf32>
    %35 = arith.truncf %34 : vector<64x36xf32> to vector<64x36xbf16>
    %c0_71 = arith.constant 0 : index
    %c0_72 = arith.constant 0 : index
    %36 = vector.load %arg2[%c0_71, %c0_72] : memref<36x8xbf16, #tpu.memory_space<vmem>>, vector<36x8xbf16>
    %cst_73 = arith.constant dense<0.000000e+00> : vector<64x8xf32>
    %37 = tpu.matmul %35, %36, %cst_73 {dimension_numbers = #tpu.dot_dimension_numbers<[1], [0], [0], [1], [0, 0, 1, 1], [], []>} : vector<64x36xbf16>, vector<36x8xbf16>, vector<64x8xf32> -> vector<64x8xf32>
    %c0_74 = arith.constant 0 : index
    %c0_75 = arith.constant 0 : index
    %38 = vector.load %arg3[%c0_74, %c0_75] : memref<1x8xf32, #tpu.memory_space<vmem>>, vector<1x8xf32>
    %39 = vector.broadcast %38 : vector<1x8xf32> to vector<64x8xf32>
    %40 = arith.addf %37, %39 : vector<64x8xf32>
    %cst_76 = arith.constant 0.000000e+00 : f32
    %41 = vector.broadcast %cst_76 : f32 to vector<64x8xf32>
    %42 = arith.maximumf %40, %41 : vector<64x8xf32>
    %cst_77 = arith.constant 0.000000e+00 : f32
    %43 = vector.broadcast %cst_77 : f32 to vector<1x10x8xf32>
    %cst_78 = arith.constant 0.000000e+00 : f32
    %44 = vector.broadcast %cst_78 : f32 to vector<10x1x8xf32>
    %c0_79 = arith.constant 0 : index
    %c0_80 = arith.constant 0 : index
    %c0_81 = arith.constant 0 : index
    %45 = vector.load %arg8[%c0_79, %c0_80, %c0_81] : memref<10x10x8xf32, #tpu.memory_space<vmem>>, vector<1x10x8xf32>
    tpu.vector_store %arg8[%c0_79, %c0_80, %c0_81], %43 {strides = array<i32>} : memref<10x10x8xf32, #tpu.memory_space<vmem>>, vector<1x10x8xf32>,
    %c9_82 = arith.constant 9 : index
    %c0_83 = arith.constant 0 : index
    %c0_84 = arith.constant 0 : index
    %46 = vector.load %arg8[%c9_82, %c0_83, %c0_84] : memref<10x10x8xf32, #tpu.memory_space<vmem>>, vector<1x10x8xf32>
    tpu.vector_store %arg8[%c9_82, %c0_83, %c0_84], %43 {strides = array<i32>} : memref<10x10x8xf32, #tpu.memory_space<vmem>>, vector<1x10x8xf32>,
    %c0_85 = arith.constant 0 : index
    %c0_86 = arith.constant 0 : index
    %c0_87 = arith.constant 0 : index
    %47 = vector.load %arg8[%c0_85, %c0_86, %c0_87] : memref<10x10x8xf32, #tpu.memory_space<vmem>>, vector<10x1x8xf32>
    tpu.vector_store %arg8[%c0_85, %c0_86, %c0_87], %44 {strides = array<i32>} : memref<10x10x8xf32, #tpu.memory_space<vmem>>, vector<10x1x8xf32>,
    %c0_88 = arith.constant 0 : index
    %c9_89 = arith.constant 9 : index
    %c0_90 = arith.constant 0 : index
    %48 = vector.load %arg8[%c0_88, %c9_89, %c0_90] : memref<10x10x8xf32, #tpu.memory_space<vmem>>, vector<10x1x8xf32>
    tpu.vector_store %arg8[%c0_88, %c9_89, %c0_90], %44 {strides = array<i32>} : memref<10x10x8xf32, #tpu.memory_space<vmem>>, vector<10x1x8xf32>,
    %49 = vector.shape_cast %42 : vector<64x8xf32> to vector<8x8x8xf32>
    %c1_91 = arith.constant 1 : index
    %c1_92 = arith.constant 1 : index
    %c0_93 = arith.constant 0 : index
    %50 = vector.load %arg8[%c1_91, %c1_92, %c0_93] : memref<10x10x8xf32, #tpu.memory_space<vmem>>, vector<8x8x8xf32>
    tpu.vector_store %arg8[%c1_91, %c1_92, %c0_93], %49 {strides = array<i32>} : memref<10x10x8xf32, #tpu.memory_space<vmem>>, vector<8x8x8xf32>,
    %c0_94 = arith.constant 0 : index
    %c0_95 = arith.constant 0 : index
    %c0_96 = arith.constant 0 : index
    %51 = vector.load %arg8[%c0_94, %c0_95, %c0_96] : memref<10x10x8xf32, #tpu.memory_space<vmem>>, vector<8x8x8xf32>
    %c0_97 = arith.constant 0 : index
    %c0_98 = arith.constant 0 : index
    %c0_99 = arith.constant 0 : index
    %52 = vector.load %arg10[%c0_97, %c0_98, %c0_99] : memref<8x8x72xf32, #tpu.memory_space<vmem>>, vector<8x8x8xf32>
    tpu.vector_store %arg10[%c0_97, %c0_98, %c0_99], %51 {strides = array<i32>} : memref<8x8x72xf32, #tpu.memory_space<vmem>>, vector<8x8x8xf32>,
    %c0_100 = arith.constant 0 : index
    %c1_101 = arith.constant 1 : index
    %c0_102 = arith.constant 0 : index
    %53 = vector.load %arg8[%c0_100, %c1_101, %c0_102] : memref<10x10x8xf32, #tpu.memory_space<vmem>>, vector<8x8x8xf32>
    %c0_103 = arith.constant 0 : index
    %c0_104 = arith.constant 0 : index
    %c8_105 = arith.constant 8 : index
    %54 = vector.load %arg10[%c0_103, %c0_104, %c8_105] : memref<8x8x72xf32, #tpu.memory_space<vmem>>, vector<8x8x8xf32>
    tpu.vector_store %arg10[%c0_103, %c0_104, %c8_105], %53 {strides = array<i32>} : memref<8x8x72xf32, #tpu.memory_space<vmem>>, vector<8x8x8xf32>,
    %c0_106 = arith.constant 0 : index
    %c2_107 = arith.constant 2 : index
    %c0_108 = arith.constant 0 : index
    %55 = vector.load %arg8[%c0_106, %c2_107, %c0_108] : memref<10x10x8xf32, #tpu.memory_space<vmem>>, vector<8x8x8xf32>
    %c0_109 = arith.constant 0 : index
    %c0_110 = arith.constant 0 : index
    %c16_111 = arith.constant 16 : index
    %56 = vector.load %arg10[%c0_109, %c0_110, %c16_111] : memref<8x8x72xf32, #tpu.memory_space<vmem>>, vector<8x8x8xf32>
    tpu.vector_store %arg10[%c0_109, %c0_110, %c16_111], %55 {strides = array<i32>} : memref<8x8x72xf32, #tpu.memory_space<vmem>>, vector<8x8x8xf32>,
    %c1_112 = arith.constant 1 : index
    %c0_113 = arith.constant 0 : index
    %c0_114 = arith.constant 0 : index
    %57 = vector.load %arg8[%c1_112, %c0_113, %c0_114] : memref<10x10x8xf32, #tpu.memory_space<vmem>>, vector<8x8x8xf32>
    %c0_115 = arith.constant 0 : index
    %c0_116 = arith.constant 0 : index
    %c24_117 = arith.constant 24 : index
    %58 = vector.load %arg10[%c0_115, %c0_116, %c24_117] : memref<8x8x72xf32, #tpu.memory_space<vmem>>, vector<8x8x8xf32>
    tpu.vector_store %arg10[%c0_115, %c0_116, %c24_117], %57 {strides = array<i32>} : memref<8x8x72xf32, #tpu.memory_space<vmem>>, vector<8x8x8xf32>,
    %c1_118 = arith.constant 1 : index
    %c1_119 = arith.constant 1 : index
    %c0_120 = arith.constant 0 : index
    %59 = vector.load %arg8[%c1_118, %c1_119, %c0_120] : memref<10x10x8xf32, #tpu.memory_space<vmem>>, vector<8x8x8xf32>
    %c0_121 = arith.constant 0 : index
    %c0_122 = arith.constant 0 : index
    %c32_123 = arith.constant 32 : index
    %60 = vector.load %arg10[%c0_121, %c0_122, %c32_123] : memref<8x8x72xf32, #tpu.memory_space<vmem>>, vector<8x8x8xf32>
    tpu.vector_store %arg10[%c0_121, %c0_122, %c32_123], %59 {strides = array<i32>} : memref<8x8x72xf32, #tpu.memory_space<vmem>>, vector<8x8x8xf32>,
    %c1_124 = arith.constant 1 : index
    %c2_125 = arith.constant 2 : index
    %c0_126 = arith.constant 0 : index
    %61 = vector.load %arg8[%c1_124, %c2_125, %c0_126] : memref<10x10x8xf32, #tpu.memory_space<vmem>>, vector<8x8x8xf32>
    %c0_127 = arith.constant 0 : index
    %c0_128 = arith.constant 0 : index
    %c40 = arith.constant 40 : index
    %62 = vector.load %arg10[%c0_127, %c0_128, %c40] : memref<8x8x72xf32, #tpu.memory_space<vmem>>, vector<8x8x8xf32>
    tpu.vector_store %arg10[%c0_127, %c0_128, %c40], %61 {strides = array<i32>} : memref<8x8x72xf32, #tpu.memory_space<vmem>>, vector<8x8x8xf32>,
    %c2_129 = arith.constant 2 : index
    %c0_130 = arith.constant 0 : index
    %c0_131 = arith.constant 0 : index
    %63 = vector.load %arg8[%c2_129, %c0_130, %c0_131] : memref<10x10x8xf32, #tpu.memory_space<vmem>>, vector<8x8x8xf32>
    %c0_132 = arith.constant 0 : index
    %c0_133 = arith.constant 0 : index
    %c48 = arith.constant 48 : index
    %64 = vector.load %arg10[%c0_132, %c0_133, %c48] : memref<8x8x72xf32, #tpu.memory_space<vmem>>, vector<8x8x8xf32>
    tpu.vector_store %arg10[%c0_132, %c0_133, %c48], %63 {strides = array<i32>} : memref<8x8x72xf32, #tpu.memory_space<vmem>>, vector<8x8x8xf32>,
    %c2_134 = arith.constant 2 : index
    %c1_135 = arith.constant 1 : index
    %c0_136 = arith.constant 0 : index
    %65 = vector.load %arg8[%c2_134, %c1_135, %c0_136] : memref<10x10x8xf32, #tpu.memory_space<vmem>>, vector<8x8x8xf32>
    %c0_137 = arith.constant 0 : index
    %c0_138 = arith.constant 0 : index
    %c56 = arith.constant 56 : index
    %66 = vector.load %arg10[%c0_137, %c0_138, %c56] : memref<8x8x72xf32, #tpu.memory_space<vmem>>, vector<8x8x8xf32>
    tpu.vector_store %arg10[%c0_137, %c0_138, %c56], %65 {strides = array<i32>} : memref<8x8x72xf32, #tpu.memory_space<vmem>>, vector<8x8x8xf32>,
    %c2_139 = arith.constant 2 : index
    %c2_140 = arith.constant 2 : index
    %c0_141 = arith.constant 0 : index
    %67 = vector.load %arg8[%c2_139, %c2_140, %c0_141] : memref<10x10x8xf32, #tpu.memory_space<vmem>>, vector<8x8x8xf32>
    %c0_142 = arith.constant 0 : index
    %c0_143 = arith.constant 0 : index
    %c64 = arith.constant 64 : index
    %68 = vector.load %arg10[%c0_142, %c0_143, %c64] : memref<8x8x72xf32, #tpu.memory_space<vmem>>, vector<8x8x8xf32>
    tpu.vector_store %arg10[%c0_142, %c0_143, %c64], %67 {strides = array<i32>} : memref<8x8x72xf32, #tpu.memory_space<vmem>>, vector<8x8x8xf32>,
    %c0_144 = arith.constant 0 : index
    %c0_145 = arith.constant 0 : index
    %c0_146 = arith.constant 0 : index
    %69 = vector.load %arg10[%c0_144, %c0_145, %c0_146] : memref<8x8x72xf32, #tpu.memory_space<vmem>>, vector<8x8x72xf32>
    %70 = vector.shape_cast %69 : vector<8x8x72xf32> to vector<64x72xf32>
    %71 = arith.truncf %70 : vector<64x72xf32> to vector<64x72xbf16>
    %c0_147 = arith.constant 0 : index
    %c0_148 = arith.constant 0 : index
    %72 = vector.load %arg4[%c0_147, %c0_148] : memref<72x8xbf16, #tpu.memory_space<vmem>>, vector<72x8xbf16>
    %cst_149 = arith.constant dense<0.000000e+00> : vector<64x8xf32>
    %73 = tpu.matmul %71, %72, %cst_149 {dimension_numbers = #tpu.dot_dimension_numbers<[1], [0], [0], [1], [0, 0, 1, 1], [], []>} : vector<64x72xbf16>, vector<72x8xbf16>, vector<64x8xf32> -> vector<64x8xf32>
    %c0_150 = arith.constant 0 : index
    %c0_151 = arith.constant 0 : index
    %74 = vector.load %arg5[%c0_150, %c0_151] : memref<1x8xf32, #tpu.memory_space<vmem>>, vector<1x8xf32>
    %75 = vector.broadcast %74 : vector<1x8xf32> to vector<64x8xf32>
    %76 = arith.addf %73, %75 : vector<64x8xf32>
    %cst_152 = arith.constant 0.000000e+00 : f32
    %77 = vector.broadcast %cst_152 : f32 to vector<64x8xf32>
    %78 = arith.maximumf %76, %77 : vector<64x8xf32>
    %79 = vector.shape_cast %78 : vector<64x8xf32> to vector<8x8x8xf32>
    %c0_153 = arith.constant 0 : index
    %c0_154 = arith.constant 0 : index
    %c0_155 = arith.constant 0 : index
    %c0_156 = arith.constant 0 : index
    %80 = vector.load %arg6[%c0_153, %c0_154, %c0_155, %c0_156] : memref<1x8x8x8xf32, #tpu.memory_space<vmem>>, vector<1x8x8x8xf32>
    %81 = vector.shape_cast %80 : vector<1x8x8x8xf32> to vector<8x8x8xf32>
    %82 = vector.shape_cast %79 : vector<8x8x8xf32> to vector<1x8x8x8xf32>
    tpu.vector_store %arg6[%c0_153, %c0_154, %c0_155, %c0_156], %82 {strides = array<i32>} : memref<1x8x8x8xf32, #tpu.memory_space<vmem>>, vector<1x8x8x8xf32>,
    return
  }
  func.func @transform_0(%arg0: i32) -> (i32, i32, i32, i32, i32) {
    %c0_i32 = arith.constant 0 : i32
    %c0_i32_0 = arith.constant 0 : i32
    %c0_i32_1 = arith.constant 0 : i32
    %c0_i32_2 = arith.constant 0 : i32
    %c0_i32_3 = arith.constant 0 : i32
    return %arg0, %c0_i32, %c0_i32_0, %c0_i32_1, %c0_i32_2 : i32, i32, i32, i32, i32
  }
  func.func @transform_1(%arg0: i32) -> (i32, i32) {
    %c0_i32 = arith.constant 0 : i32
    %c0_i32_0 = arith.constant 0 : i32
    %c0_i32_1 = arith.constant 0 : i32
    return %c0_i32, %c0_i32_0 : i32, i32
  }
  func.func @transform_2(%arg0: i32) -> (i32, i32) {
    %c0_i32 = arith.constant 0 : i32
    %c0_i32_0 = arith.constant 0 : i32
    %c0_i32_1 = arith.constant 0 : i32
    return %c0_i32, %c0_i32_0 : i32, i32
  }
  func.func @transform_3(%arg0: i32) -> (i32, i32) {
    %c0_i32 = arith.constant 0 : i32
    %c0_i32_0 = arith.constant 0 : i32
    %c0_i32_1 = arith.constant 0 : i32
    return %c0_i32, %c0_i32_0 : i32, i32
  }
  func.func @transform_4(%arg0: i32) -> (i32, i32) {
    %c0_i32 = arith.constant 0 : i32
    %c0_i32_0 = arith.constant 0 : i32
    %c0_i32_1 = arith.constant 0 : i32
    return %c0_i32, %c0_i32_0 : i32, i32
  }
  func.func @transform_5(%arg0: i32) -> (i32, i32, i32, i32) {
    %c0_i32 = arith.constant 0 : i32
    %c0_i32_0 = arith.constant 0 : i32
    %c0_i32_1 = arith.constant 0 : i32
    %c0_i32_2 = arith.constant 0 : i32
    return %arg0, %c0_i32, %c0_i32_0, %c0_i32_1 : i32, i32, i32, i32
  }
}

</mosaic_0001>

<bundles_post_ra>
// kernel: downsample_forward.1
= control target key start
LH: loop header
LB: loop body
LE: loop exit
PB: predicated region body
PF: predicated region fallthrough
CT: control target
= control target key end

     0   :  { %10 = vsyncpa [#allocation7], 0  ;;  %s2885_s0 = inlined_call_operand.hbm [shape: f32[2,8,2,8,8], index: 0, kind: input, shape index: {}]   ;;  %s2886_s1 = inlined_call_operand.hbm [shape: bf16[36,8], index: 1, kind: input, shape index: {}]   ;;  %s2887_s2 = inlined_call_operand.hbm [shape: f32[1,8], index: 2, kind: input, shape index: {}]   ;;  %s2888_s3 = inlined_call_operand.hbm [shape: bf16[72,8], index: 3, kind: input, shape index: {}]   ;;  %s2889_s4 = inlined_call_operand.hbm [shape: f32[1,8], index: 4, kind: input, shape index: {}]   ;;  %s2890_s5 = inlined_call_operand.hbm [shape: f32[2,8,8,8], index: 5, kind: output, shape index: {}]  }
   0x1   :  { %12 = vsyncpa [#allocation7 + $0x1], 0 }
   0x2   :  { %13 = vsyncpa [#allocation10], 0 }
   0x3   :  { %14 = vsyncpa [#allocation13], 0 }
   0x4   :  { %15 = vsyncpa [#allocation8], 0 }
   0x5   :  { %17 = vsyncpa [#allocation8 + $0x1], 0  ;;  %s2149_s18 = smov 0   ;;  %s2151_s19 = smov 0  }
   0x6   :  { %s2153_s20 = smov 0   ;;  %s2155_s21 = smov 0  }
   0x7 LB: > { %s2170_s22 = sadd.s32 4294967295, %s2092_s21   ;;  %s1662_s23 = sadd.s32 4294967294, %s2092_s21   ;;  %s2092_s21 = sphi %s2155_s21, %s2913_s21   ;;  %s2088_s20 = sphi %s2153_s20, %s2912_s20   ;;  %s2084_s19 = sphi %s2151_s19, %s2911_s19   ;;  %s2080_s18 = sphi %s2149_s18, %s2910_s18  }
   0x8   : > { %p43_p0 = scmp.ne.s32.totalorder %s2084_s19, %s2080_s18  ;;  %p2891_p1 = scmp.eq.s32.totalorder %s2170_s22, 0 }
   0x9   : > { %p157_p3 = scmp.eq.s32.totalorder %s1662_s23, 1  ;;  %p1663_p5 = scmp.ge.s32.totalorder %s2092_s21, 1 }
   0xa   : > { %p2179_p4 = por %p2891_p1, %p43_p0  ;;  %p164_p7 = scmp.lt.s32.totalorder %s2092_s21, 3 }
   0xb   : > { %p2184_p6 = por %p157_p3, %p43_p0  ;;  %s2094_s27 = smov [#allocation9]  }
   0xc   : > { %s2894_s24 = scalar_select %p2179_p4, 1, 0 }
   0xd   : > { %s2895_s25 = scalar_select %p2184_p6, 1, 0 }
   0xe   : > { %p2189_p8 = pnand %p1663_p5, %p164_p7  ;;  %s176_s28 = sshll.u32 %s2094_s27, 4  ;;  %s2193_s28 = int_to_ptr.vmem [resolvable:$true] %s176_s28 }
   0xf   : > { %s2095_s30 = smov [#allocation12]   ;;  %s2096_s7 = smov [#allocation11]  }
  0x10   : > { %s2896_s26 = scalar_select %p2189_p8, 1, 0 }
  0x11   : > { %p1782_p9 = pneg %p2189_p8  ;;  %s200_s6 = sshll.u32 %s2095_s30, 4  ;;  %s2204_s6 = int_to_ptr.vmem [resolvable:$true] %s200_s6 }
  0x12   : > { %s2206_s8 = sshll.u32 %s2096_s7, 4  ;;  %s1876_s11 = scalar_lea.hbm %s2886_s1, 320  ;;  %s191_s8 = int_to_ptr.vmem [resolvable:$true] %s2206_s8 }
  0x13   : > { %p2200_p11 = pnand %p1782_p9, %p2891_p1  ;;  %p1877_p12 = scmp.ne.s32.totalorder %s2886_s1, %s1876_s11 }
  0x14   : > { %p1883_p5 = scmp.lt.u32.totalorder %s1876_s11, %s2886_s1 }
  0x15   : > { %p2216_p13 = pneg %p2200_p11 }
  0x17   : > { %p1879_p0 = pnand %p2216_p13, %p1877_p12 }
  0x19   : > { %p1880_p3 = pneg %p1879_p0 }
  0x1b   : > { %p1885_p7 = pnand %p1883_p5, %p1880_p3 }
  0x1d   : > { %1888 = shalt.err (!%p1885_p7)
}
  0x1e   : > { %s1889_s17 = scalar_lea.vmem %s2193_s28, 320  ;;  %p1897_p2 = scmp.lt.s32.totalorder %s2193_s28, %s2193_s28 }
  0x1f   : > { %p1890_p9 = scmp.ne.s32.totalorder %s2193_s28, %s1889_s17  ;;  %p1898_p6 = scmp.lt.s32.totalorder %s1889_s17, %s1889_s17 }
  0x21   : > { %p1892_p10 = pnand %p1890_p9, %p2216_p13  ;;  %p1899_p12 = por %p1898_p6, %p1897_p2 }
  0x23   : > { %p1893_p1 = pneg %p1892_p10 }
  0x25   : > { %p1900_p0 = pnand %p1899_p12, %p1893_p1 }
  0x27   : > { %1903 = shalt.err (!%p1900_p0)
}
  0x28   : > { %s2097_s23 = smov 64   ;;  %s2098_s27 = smov 4  }
  0x29   : > { %1785 = dma.hbm_to_vmem [thread:$0]  (!%p2200_p11), %s2886_s1, 320, %s2193_s28, [#allocation10], %s2097_s23, %s2097_s23, %s2098_s27  }
  0x2a   : > { %s1904_s11 = scalar_lea.hbm %s2888_s3, 576 }
  0x2b   : > { %p1905_p2 = scmp.ne.s32.totalorder %s2888_s3, %s1904_s11  ;;  %p1911_p10 = scmp.lt.u32.totalorder %s1904_s11, %s2888_s3 }
  0x2d   : > { %p1907_p1 = pnand %p1905_p2, %p2216_p13 }
  0x2f   : > { %p1908_p6 = pneg %p1907_p1 }
  0x31   : > { %p1913_p3 = pnand %p1911_p10, %p1908_p6 }
  0x33   : > { %1916 = shalt.err (!%p1913_p3)
}
  0x34   : > { %s1917_s28 = scalar_lea.vmem %s2204_s6, 576  ;;  %p1925_p12 = scmp.lt.s32.totalorder %s2204_s6, %s2204_s6 }
  0x35   : > { %p1918_p5 = scmp.ne.s32.totalorder %s2204_s6, %s1917_s28  ;;  %p1926_p0 = scmp.lt.s32.totalorder %s1917_s28, %s1917_s28 }
  0x37   : > { %p1920_p7 = pnand %p1918_p5, %p2216_p13  ;;  %p1927_p2 = por %p1926_p0, %p1925_p12 }
  0x39   : > { %p1921_p9 = pneg %p1920_p7 }
  0x3b   : > { %p1928_p1 = pnand %p1927_p2, %p1921_p9 }
  0x3d   : > { %1931 = shalt.err (!%p1928_p1)
}
  0x3e   : > { %1791 = dma.hbm_to_vmem [thread:$0]  (!%p2200_p11), %s2888_s3, 576, %s2204_s6, [#allocation13], %s2097_s23, %s2097_s23, %s2098_s27  }
  0x3f   : > { %s1932_s10 = scalar_lea.hbm %s2887_s2, 16 }
  0x40   : > { %p1933_p6 = scmp.ne.s32.totalorder %s2887_s2, %s1932_s10  ;;  %p1939_p5 = scmp.lt.u32.totalorder %s1932_s10, %s2887_s2 }
  0x42   : > { %p1935_p10 = pnand %p1933_p6, %p2216_p13 }
  0x44   : > { %p1936_p3 = pneg %p1935_p10 }
  0x46   : > { %p1941_p7 = pnand %p1939_p5, %p1936_p3 }
  0x48   : > { %1944 = shalt.err (!%p1941_p7)
}
  0x49   : > { %s1945_s16 = scalar_lea.vmem %s191_s8, 16  ;;  %s1952_s6 = scalar_lea.vmem %s191_s8, 32 }
  0x4a   : > { %p1946_p9 = scmp.ne.s32.totalorder %s191_s8, %s1945_s16  ;;  %p1953_p2 = scmp.lt.s32.totalorder %s191_s8, %s191_s8 }
  0x4b   : > { %p1954_p1 = scmp.lt.s32.totalorder %s1952_s6, %s1945_s16 }
  0x4c   : > { %p1948_p12 = pnand %p1946_p9, %p2216_p13 }
  0x4d   : > { %p1955_p4 = por %p1954_p1, %p1953_p2 }
  0x4e   : > { %p1949_p0 = pneg %p1948_p12 }
  0x50   : > { %p1956_p8 = pnand %p1955_p4, %p1949_p0 }
  0x52   : > { %1959 = shalt.err (!%p1956_p8)
}
  0x53   : > { %1788 = dma.hbm_to_vmem [thread:$0]  (!%p2200_p11), %s2887_s2, 16, %s191_s8, [#allocation10]  }
  0x54   : > { %s2099_s28 = smov [#allocation14]   ;;  %s1960_s9 = scalar_lea.hbm %s2889_s4, 16 }
  0x55   : > { %s214_s17 = sshll.u32 %s2099_s28, 4  ;;  %p1961_p6 = scmp.ne.s32.totalorder %s2889_s4, %s1960_s9  ;;  %s215_s17 = int_to_ptr.vmem [resolvable:$true] %s214_s17 }
  0x56   : > { %p1967_p10 = scmp.lt.u32.totalorder %s1960_s9, %s2889_s4 }
  0x57   : > { %p1963_p4 = pnand %p1961_p6, %p2216_p13 }
  0x59   : > { %p1964_p8 = pneg %p1963_p4 }
  0x5b   : > { %p1969_p3 = pnand %p1967_p10, %p1964_p8 }
  0x5d   : > { %1972 = shalt.err (!%p1969_p3)
}
  0x5e   : > { %s1973_s8 = scalar_lea.vmem %s215_s17, 16  ;;  %s1980_s15 = scalar_lea.vmem %s215_s17, 32 }
  0x5f   : > { %p1974_p5 = scmp.ne.s32.totalorder %s215_s17, %s1973_s8  ;;  %p1981_p12 = scmp.lt.s32.totalorder %s215_s17, %s215_s17 }
  0x60   : > { %p1982_p0 = scmp.lt.s32.totalorder %s1980_s15, %s1973_s8 }
  0x61   : > { %p1976_p7 = pnand %p1974_p5, %p2216_p13 }
  0x62   : > { %p1983_p2 = por %p1982_p0, %p1981_p12 }
  0x63   : > { %p1977_p9 = pneg %p1976_p7 }
  0x65   : > { %p1984_p1 = pnand %p1983_p2, %p1977_p9 }
  0x67   : > { %1987 = shalt.err (!%p1984_p1)
}
  0x68   : > { %1794 = dma.hbm_to_vmem [thread:$0]  (!%p2200_p11), %s2889_s4, 16, %s215_s17, [#allocation13]  }
  0x69   : > { %s2298_s14 = sadd.s32 1, %s2092_s21   ;;  %s30_s23 = sadd.s32 1, %s2088_s20 }
  0x6a   : > { %s27_s29 = ssub.s32 %s2092_s21, %s2298_s14  ;;  %p37_p13 = scmp.ne.s32.totalorder %s2088_s20, %s2084_s19 }
  0x6b   : > { %p28_p6 = scmp.eq.s32.totalorder %s27_s29, 0  ;;  %p38_p4 = scmp.eq.s32.totalorder %s2092_s21, 0 }
  0x6c   : > { %p2899_p8 = scmp.eq.s32.totalorder %s2170_s22, 1  ;;  %p1807_p3 = scmp.lt.s32.totalorder %s2092_s21, 2 }
  0x6d   : > { %s2314_s28 = scalar_select %p28_p6, %s2088_s20, %s30_s23  }
  0x6e   : > { %p2308_p10 = por %p2899_p8, %p37_p13  ;;  %p39_p5 = por %p38_p4, %p37_p13 }
  0x6f   : > { %s225_s30 = sand.u32 1, %s2088_s20   ;;  %s1710_s17 = sshll.u32 %s2092_s21, 11 }
  0x70   : > { %s1669_s7 = sshll.u32 %s225_s30, 7  ;;  %s2321_s11 = scalar_lea.hbm %s2885_s0, %s1710_s17 }
  0x71   : > { %s229_s12 = scalar_lea.vmem [#allocation6], %s1669_s7  ;;  %p2325_p11 = pnand %p1807_p3, %p39_p5 }
  0x72   : > { %s236_s13 = sshll.u32 %s229_s12, 4  ;;  %s2329_s15 = scalar_lea.sflag [#allocation7], %s225_s30  ;;  %s2323_s13 = int_to_ptr.vmem [resolvable:$true] %s236_s13 }
  0x73   : > { %s1988_s16 = scalar_lea.hbm %s2321_s11, 2048  ;;  %p1990_p9 = pneg %p2325_p11 }
  0x74   : > { %p1989_p7 = scmp.ne.s32.totalorder %s2321_s11, %s1988_s16  ;;  %s1993_s29 = scalar_lea.hbm %s2885_s0, 4096 }
  0x75   : > { %p1994_p2 = scmp.lt.u32.totalorder %s2321_s11, %s2885_s0  ;;  %p1995_p1 = scmp.lt.u32.totalorder %s1993_s29, %s1988_s16 }
  0x76   : > { %p1991_p12 = pnand %p1990_p9, %p1989_p7  ;;  %p1997_p6 = scmp.lt.u32.totalorder %s1988_s16, %s2321_s11 }
  0x77   : > { %p1996_p13 = por %p1995_p1, %p1994_p2 }
  0x78   : > { %p1992_p0 = pneg %p1991_p12 }
  0x79   : > { %p1998_p4 = por %p1997_p6, %p1996_p13 }
  0x7b   : > { %p1999_p8 = pnand %p1998_p4, %p1992_p0 }
  0x7d   : > { %2002 = shalt.err (!%p1999_p8)
}
  0x7e   : > { %s2003_s30 = scalar_lea.vmem %s2323_s13, 2048  ;;  %s2100_s9 = smov [#allocation6]  }
  0x7f   : > { %p2004_p3 = scmp.ne.s32.totalorder %s2323_s13, %s2003_s30  ;;  %s2008_s10 = sshll.u32 %s2100_s9, 4  ;;  %s2009_s10 = int_to_ptr.vmem [resolvable:$false] %s2008_s10 }
  0x80   : > { %s2010_s12 = scalar_lea.vmem %s2009_s10, 4096  ;;  %p2011_p12 = scmp.lt.s32.totalorder %s2323_s13, %s2009_s10 }
  0x81   : > { %p2006_p5 = pnand %p2004_p3, %p1990_p9  ;;  %p2012_p2 = scmp.lt.s32.totalorder %s2010_s12, %s2003_s30 }
  0x83   : > { %p2007_p7 = pneg %p2006_p5  ;;  %p2013_p1 = por %p2012_p2, %p2011_p12 }
  0x85   : > { %p2014_p13 = pnand %p2013_p1, %p2007_p7 }
  0x87   : > { %2017 = shalt.err (!%p2014_p13)
}
  0x88   : > { %s2101_s16 = smov 128   ;;  %s2102_s6 = smov 8  }
  0x89   : > { %1798 = dma.hbm_to_vmem [thread:$0]  (!%p2325_p11), %s2321_s11, 2048, %s2323_s13, %s2329_s15, %s2101_s16, %s2101_s16, %s2102_s6  }
  0x8a   : > { %p2902_p9 = scmp.ne.s32.totalorder %s2896_s26, 0 }
  0x8b   : > { %s2360_s23 = sand.u32 (!%p2902_p9), 1, %s2084_s19   ;;  %p2903_p0 = scmp.ne.s32.totalorder (!%p2902_p9), %s2894_s24, 0 }
  0x8c   : > { %248 = sbr.rel (%p2902_p9) target bundleno = 1176 (0x498), region = 40  ;;  %s1673_s29 = sshll.u32 (!%p2902_p9), %s2360_s23, 7 }
  0x8d   : > { %s251_s7 = scalar_lea.sflag (!%p2902_p9), [#allocation7], %s2360_s23  ;;  %s2364_s17 = scalar_lea.vmem (!%p2902_p9), [#allocation6], %s1673_s29 }
  0x93   : > { %2063 = dma.done.wait (%p2903_p0), %s251_s7, 2048  }
  0x94   : > { %2065 = vsyncadd (%p2903_p0), %s251_s7, 4294965248  ;;  %p2904_p11 = scmp.eq.s32.totalorder %s2170_s22, 0 }
  0x96   : > { %2067 = dma.done.wait (%p2904_p11), [#allocation10], 336   ;;  %p2905_p6 = pmov %p2904_p11 }
  0x98   : > { %2069 = vsyncadd (%p2905_p6), [#allocation10], 4294966960  ;;  %p2906_p4 = pmov %p2905_p6 }
  0x9a   : > { %2071 = dma.done.wait (%p2906_p4), [#allocation13], 592   ;;  %p2907_p8 = pmov %p2906_p4 }
  0x9b   : > { %vm363_vm0 = vcmask 31744   ;;  %vm370_vm1 = vcmask 24576   ;;  %v2103_v0 = vmov 0.0   ;;  %vm365_vm2 = vcmask 25600   ;;  %v298_v1 = vld [vmem:[%s2364_s17] sm:$0xff]  ;;  %v1679_v2 = vld [vmem:[%s2364_s17 + $0x8] sm:$0xff] }
  0x9c   : > { %2073 = vsyncadd (%p2907_p8), [#allocation13], 4294966704  ;;  %368 = vst.msk [vmem:[#allocation2 + $0x90] sm:$0xff] %vm363_vm0, %v2103_v0  ;;  %v300_v3 = vld [vmem:[%s2364_s17 + $0x20] sm:$0xff]  ;;  %v315_v4 = vmax.f32 %v298_v1, %v1679_v2  ;;  %v1681_v5 = vld [vmem:[%s2364_s17 + $0x28] sm:$0xff]  ;;  %s2104_s24 = smov 124  }
  0x9d   : > { %364 = vst.msk [vmem:[#allocation2] sm:$0xff] %vm363_vm0, %v2103_v0  ;;  %v299_v6 = vld [vmem:[%s2364_s17 + $0x10] sm:$0xff]  ;;  %v1680_v7 = vld [vmem:[%s2364_s17 + $0x18] sm:$0xff]  ;;  %v317_v8 = vmax.f32 %v300_v3, %v1681_v5  ;;  %v302_v13 = vld [vmem:[%s2364_s17 + $0x40] sm:$0xff]  ;;  %s2105_s26 = smov 4   ;;  %s2106_s11 = smov 24  }
  0x9e   : > { %372 = vst.msk [vmem:[#allocation2 + $0x10] sm:$0x1] %vm370_vm1, %v2103_v0  ;;  %373 = vst.msk [vmem:[#allocation2 + $0x20] sm:$0x1] %vm370_vm1, %v2103_v0  ;;  %v301_v9 = vld [vmem:[%s2364_s17 + $0x30] sm:$0xff]  ;;  %v1682_v10 = vld [vmem:[%s2364_s17 + $0x38] sm:$0xff]  ;;  %331 = vrot.lane.b32.xlu0 %v315_v4, %s2104_s24  ;;  %v316_v11 = vmax.f32 %v299_v6, %v1680_v7 }
  0x9f   : > { %374 = vst.msk [vmem:[#allocation2 + $0x30] sm:$0x1] %vm370_vm1, %v2103_v0  ;;  %375 = vst.msk [vmem:[#allocation2 + $0x40] sm:$0x1] %vm370_vm1, %v2103_v0  ;;  %335 = vrot.lane.b32.xlu1 %v317_v8, %s2104_s24  ;;  %v318_v12 = vmax.f32 %v301_v9, %v1682_v10  ;;  %v1683_v14 = vld [vmem:[%s2364_s17 + $0x48] sm:$0xff]  ;;  %v303_v15 = vld [vmem:[%s2364_s17 + $0x50] sm:$0xff] }
  0xa0   : > { %376 = vst.msk [vmem:[#allocation2 + $0x50] sm:$0x1] %vm370_vm1, %v2103_v0  ;;  %377 = vst.msk [vmem:[#allocation2 + $0x60] sm:$0x1] %vm370_vm1, %v2103_v0  ;;  %v1684_v16 = vld [vmem:[%s2364_s17 + $0x58] sm:$0xff]  ;;  %v304_v17 = vld [vmem:[%s2364_s17 + $0x60] sm:$0xff]  ;;  %v319_v19 = vmax.f32 %v302_v13, %v1683_v14 }
  0xa1   : > { %378 = vst.msk [vmem:[#allocation2 + $0x70] sm:$0x1] %vm370_vm1, %v2103_v0  ;;  %379 = vst.msk [vmem:[#allocation2 + $0x80] sm:$0x1] %vm370_vm1, %v2103_v0  ;;  %v1685_v18 = vld [vmem:[%s2364_s17 + $0x68] sm:$0xff]  ;;  %v305_v20 = vld [vmem:[%s2364_s17 + $0x70] sm:$0xff]  ;;  %v320_v22 = vmax.f32 %v303_v15, %v1684_v16 }
  0xa2   : > { %382 = vst.msk [vmem:[#allocation2 + $0x19] sm:$0x1] %vm370_vm1, %v2103_v0  ;;  %383 = vst.msk [vmem:[#allocation2 + $0x29] sm:$0x1] %vm370_vm1, %v2103_v0  ;;  %333 = vrot.lane.b32.xlu0 %v316_v11, %s2104_s24  ;;  %v1686_v21 = vld [vmem:[%s2364_s17 + $0x78] sm:$0xff]  ;;  %v321_v23 = vmax.f32 %v304_v17, %v1685_v18  ;;  %s2107_s13 = smov 8  }
  0xa3   : > { %384 = vst.msk [vmem:[#allocation2 + $0x39] sm:$0x1] %vm370_vm1, %v2103_v0  ;;  %385 = vst.msk [vmem:[#allocation2 + $0x49] sm:$0x1] %vm370_vm1, %v2103_v0  ;;  %337 = vrot.lane.b32.xlu1 %v318_v12, %s2104_s24  ;;  %v322_v24 = vmax.f32 %v305_v20, %v1686_v21  ;;  %s2108_s8 = smov 28   ;;  %vm456_vm3 = vcmask 64544  }
  0xa4   : > { %386 = vst.msk [vmem:[#allocation2 + $0x59] sm:$0x1] %vm370_vm1, %v2103_v0  ;;  %387 = vst.msk [vmem:[#allocation2 + $0x69] sm:$0x1] %vm370_vm1, %v2103_v0  ;;  %vm505_vm4 = vcmask 97344   ;;  %s2109_s15 = smov 12  }
  0xa5   : > { %388 = vst.msk [vmem:[#allocation2 + $0x79] sm:$0x1] %vm370_vm1, %v2103_v0  ;;  %389 = vst.msk [vmem:[#allocation2 + $0x89] sm:$0x1] %vm370_vm1, %v2103_v0  ;;  %s2110_s30 = smov 16   ;;  %s2111_s9 = smov 20  }
  0xa6   : > { %380 = vst.msk [vmem:[#allocation2 + $0x90] sm:$0x1] %vm370_vm1, %v2103_v0  ;;  %371 = vst.msk [vmem:[#allocation2] sm:$0x1] %vm370_vm1, %v2103_v0  ;;  %339 = vrot.lane.b32.xlu0 %v319_v19, %s2104_s24  ;;  %v1868_v63 = vld [vmem:[#allocation9] sm:$0xff]   ;;  %v1869_v2 = vld [vmem:[#allocation9 + $0x8] sm:$0xff]  }
  0xa7   : > { %369 = vst.msk [vmem:[#allocation2 + $0x98] sm:$0x3] %vm365_vm2, %v2103_v0  ;;  %366 = vst.msk [vmem:[#allocation2 + $0x8] sm:$0x3] %vm365_vm2, %v2103_v0  ;;  %341 = vrot.lane.b32.xlu1 %v320_v22, %s2104_s24  ;;  %1728 = vmatprep.subr.bf16.mxu0 %v1868_v63  ;;  %s2112_s10 = smov 32   ;;  %vm861_vm5 = vcmask 1041408  }
  0xa8   : > { %390 = vst.msk [vmem:[#allocation2 + $0x99] sm:$0x1] %vm370_vm1, %v2103_v0  ;;  %381 = vst.msk [vmem:[#allocation2 + $0x9] sm:$0x1] %vm370_vm1, %v2103_v0  ;;  %1729 = vmatpush3.bf16.msra.mxu0 %v1868_v63  ;;  %vm554_vm6 = vcmask 130144   ;;  %vm603_vm7 = vcmask 162944  }
  0xa9   : > { %1730 = vmatprep.subr.bf16.mxu0 %v1869_v2  ;;  %v1870_v3 = vld [vmem:[#allocation9 + $0x10] ss:$0 sps:$4 sm:$0x33]   ;;  %vm652_vm8 = vcmask 195744   ;;  %vm702_vm9 = vcmask 228544   ;;  %vm751_vm10 = vcmask 261344  }
  0xaa   : > { %343 = vrot.lane.b32.xlu0 %v321_v23, %s2104_s24  ;;  %vm800_vm11 = vcmask 294144   ;;  %vm848_vm12 = vcmask 293888   ;;  %vm938_vm13 = vcmask 64512   ;;  %vm940_vm14 = vcmask 58368   ;;  %s2113_s12 = smov 48   ;;  %s2114_s16 = smov 56  }
  0xab   : > { %345 = vrot.lane.b32.xlu1 %v322_v24, %s2104_s24  ;;  %939 = vst.msk [vmem:[#allocation3] sm:$0xff] %vm938_vm13, %v2103_v0  ;;  %943 = vst.msk [vmem:[#allocation3 + $0x90] sm:$0xff] %vm938_vm13, %v2103_v0  ;;  %vm945_vm15 = vcmask 57344   ;;  %vm1080_vm1 = vcmask 195712   ;;  %s2115_s6 = smov 40   ;;  %s2116_s29 = smov 64  }
  0xac   : > { %1731 = vmatpush3.bf16.msra.mxu0 %v1869_v2  ;;  %941 = vst.msk [vmem:[#allocation3 + $0x8] sm:$0x3] %vm940_vm14, %v2103_v0  ;;  %944 = vst.msk [vmem:[#allocation3 + $0x98] sm:$0x3] %vm940_vm14, %v2103_v0  ;;  %vm1452_vm2 = vcmask 1043456   ;;  %s1678_s7 = sshll.u32 %s2360_s23, 6 }
  0xad   : > { %v669_v26 = vld [vmem:[#allocation2 + $0x90] sm:$0xff]  ;;  %v400_v29 = vld [vmem:[#allocation2] sm:$0xff]  ;;  %1760 = vmatprep.subr.msk.bf16.mxu0 %vm861_vm5, %v1870_v3  ;;  %946 = vst.msk [vmem:[#allocation3] sm:$0x1] %vm945_vm15, %v2103_v0  ;;  %947 = vst.msk [vmem:[#allocation3 + $0x10] sm:$0x1] %vm945_vm15, %v2103_v0 }
  0xae   : > { %v416_v25 = vld [vmem:[#allocation2 + $0x1] sm:$0xff]  ;;  %v718_v28 = vld [vmem:[#allocation2 + $0x91] sm:$0xff]  ;;  %408 = vst.msk [vmem:[#allocation4] sm:$0xff] %vm363_vm0, %v400_v29  ;;  %s296_s17 = scalar_lea.vmem [#allocation15], %s1678_s7  ;;  %s1711_s24 = sshll.u32 %s2170_s22, 10 }
  0xaf   : > { %432 = vrot.lane.b32.xlu0 %v416_v25, %s2105_s26  ;;  %692 = vrot.lane.b32.xlu1 %v669_v26, %s2106_s11  ;;  %v465_v27 = vld [vmem:[#allocation2 + $0x2] sm:$0xff]  ;;  %v767_v15 = vld [vmem:[#allocation2 + $0x92] sm:$0xff]  ;;  %948 = vst.msk [vmem:[#allocation3 + $0x20] sm:$0x1] %vm945_vm15, %v2103_v0  ;;  %949 = vst.msk [vmem:[#allocation3 + $0x30] sm:$0x1] %vm945_vm15, %v2103_v0 }
  0xb0   : > { %950 = vst.msk [vmem:[#allocation3 + $0x40] sm:$0x1] %vm945_vm15, %v2103_v0  ;;  %951 = vst.msk [vmem:[#allocation3 + $0x50] sm:$0x1] %vm945_vm15, %v2103_v0  ;;  %s1538_s22 = scalar_lea.sflag [#allocation8], %s2360_s23 }
  0xb1   : > { %952 = vst.msk [vmem:[#allocation3 + $0x60] sm:$0x1] %vm945_vm15, %v2103_v0  ;;  %953 = vst.msk [vmem:[#allocation3 + $0x70] sm:$0x1] %vm945_vm15, %v2103_v0 }
  0xb2   : > { %954 = vst.msk [vmem:[#allocation3 + $0x80] sm:$0x1] %vm945_vm15, %v2103_v0  ;;  %955 = vst.msk [vmem:[#allocation3 + $0x90] sm:$0x1] %vm945_vm15, %v2103_v0 }
  0xb3   : > { %481 = vrot.lane.b32.xlu0 %v465_v27, %s2107_s13  ;;  %741 = vrot.lane.b32.xlu1 %v718_v28, %s2108_s8  ;;  %957 = vst.msk [vmem:[#allocation3 + $0x19] sm:$0x1] %vm945_vm15, %v2103_v0  ;;  %958 = vst.msk [vmem:[#allocation3 + $0x29] sm:$0x1] %vm945_vm15, %v2103_v0 }
  0xb4   : > { %959 = vst.msk [vmem:[#allocation3 + $0x39] sm:$0x1] %vm945_vm15, %v2103_v0  ;;  %960 = vst.msk [vmem:[#allocation3 + $0x49] sm:$0x1] %vm945_vm15, %v2103_v0 }
  0xb5   : > { %961 = vst.msk [vmem:[#allocation3 + $0x59] sm:$0x1] %vm945_vm15, %v2103_v0  ;;  %962 = vst.msk [vmem:[#allocation3 + $0x69] sm:$0x1] %vm945_vm15, %v2103_v0 }
  0xb6   : > { %963 = vst.msk [vmem:[#allocation3 + $0x79] sm:$0x1] %vm945_vm15, %v2103_v0  ;;  %964 = vst.msk [vmem:[#allocation3 + $0x89] sm:$0x1] %vm945_vm15, %v2103_v0 }
  0xb7   : > { %956 = vst.msk [vmem:[#allocation3 + $0x9] sm:$0x1] %vm945_vm15, %v2103_v0  ;;  %965 = vst.msk [vmem:[#allocation3 + $0x99] sm:$0x1] %vm945_vm15, %v2103_v0 }
 0x110   : > { %v332_v30 = vpop.permute.xlu0 %331 }
 0x111   : > { %v355_v31 = vmax.f32 %v315_v4, %v332_v30  ;;  %v336_v32 = vpop.permute.xlu1 %335  ;;  %v863_v4 = vsel %vm861_vm5, %v1870_v3, 0  ;;  %vm1227_vm5 = vcmask 392512  }
 0x112   : > { %v357_v33 = vmax.f32 %v317_v8, %v336_v32  ;;  %1733 = vmatpush3.bf16.msra.mxu0 %v863_v4 }
 0x113   : > { %392 = vst.msk [vmem:[#allocation2 + $0x11] sm:$0xff] %vm363_vm0, %v355_v31 }
 0x114   : > { %394 = vst.msk [vmem:[#allocation2 + $0x31] sm:$0xff] %vm363_vm0, %v357_v33  ;;  %v334_v34 = vpop.permute.xlu0 %333 }
 0x115   : > { %v356_v35 = vmax.f32 %v316_v11, %v334_v34  ;;  %v338_v36 = vpop.permute.xlu1 %337 }
 0x116   : > { %v358_v37 = vmax.f32 %v318_v12, %v338_v36 }
 0x117   : > { %393 = vst.msk [vmem:[#allocation2 + $0x21] sm:$0xff] %vm363_vm0, %v356_v35 }
 0x118   : > { %395 = vst.msk [vmem:[#allocation2 + $0x41] sm:$0xff] %vm363_vm0, %v358_v37  ;;  %v340_v38 = vpop.permute.xlu0 %339 }
 0x119   : > { %v359_v39 = vmax.f32 %v319_v19, %v340_v38  ;;  %v342_v40 = vpop.permute.xlu1 %341 }
 0x11a   : > { %v417_v41 = vld [vmem:[#allocation2 + $0x11] sm:$0xff]  ;;  %v360_v43 = vmax.f32 %v320_v22, %v342_v40 }
 0x11b   : > { %v514_v42 = vld [vmem:[#allocation2 + $0x10] sm:$0xff]  ;;  %434 = vrot.lane.b32.xlu1 %v417_v41, %s2105_s26  ;;  %396 = vst.msk [vmem:[#allocation2 + $0x51] sm:$0xff] %vm363_vm0, %v359_v39 }
 0x11c   : > { %v516_v44 = vld [vmem:[#allocation2 + $0x30] sm:$0xff]  ;;  %409 = vst.msk [vmem:[#allocation4 + $0x8] sm:$0xff] %vm363_vm0, %v514_v42  ;;  %397 = vst.msk [vmem:[#allocation2 + $0x61] sm:$0xff] %vm363_vm0, %v360_v43  ;;  %v344_v46 = vpop.permute.xlu0 %343 }
 0x11d   : > { %v419_v45 = vld [vmem:[#allocation2 + $0x31] sm:$0xff]  ;;  %411 = vst.msk [vmem:[#allocation4 + $0x18] sm:$0xff] %vm363_vm0, %v516_v44  ;;  %v361_v47 = vmax.f32 %v321_v23, %v344_v46  ;;  %v346_v48 = vpop.permute.xlu1 %345 }
 0x11e   : > { %v418_v49 = vld [vmem:[#allocation2 + $0x21] sm:$0xff]  ;;  %v362_v51 = vmax.f32 %v322_v24, %v346_v48  ;;  %v466_v54 = vld [vmem:[#allocation2 + $0x12] sm:$0xff] }
 0x11f   : > { %v515_v50 = vld [vmem:[#allocation2 + $0x20] sm:$0xff]  ;;  %438 = vrot.lane.b32.xlu1 %v419_v45, %s2105_s26  ;;  %436 = vrot.lane.b32.xlu0 %v418_v49, %s2105_s26  ;;  %398 = vst.msk [vmem:[#allocation2 + $0x71] sm:$0xff] %vm363_vm0, %v361_v47  ;;  %v468_v59 = vld [vmem:[#allocation2 + $0x32] sm:$0xff] }
 0x120   : > { %v517_v52 = vld [vmem:[#allocation2 + $0x40] sm:$0xff]  ;;  %410 = vst.msk [vmem:[#allocation4 + $0x10] sm:$0xff] %vm363_vm0, %v515_v50  ;;  %399 = vst.msk [vmem:[#allocation2 + $0x81] sm:$0xff] %vm363_vm0, %v362_v51 }
 0x121   : > { %v433_v53 = vpop.permute.xlu0 %432  ;;  %412 = vst.msk [vmem:[#allocation4 + $0x20] sm:$0xff] %vm363_vm0, %v517_v52  ;;  %v467_v55 = vld [vmem:[#allocation2 + $0x22] sm:$0xff]  ;;  %v2527_v13 = vpop.permute.xlu1 %692 }
 0x122   : > { %457 = vst.msk [vmem:[#allocation4] sm:$0xff] %vm456_vm3, %v433_v53  ;;  %v2461_v56 = vld [vmem:[#allocation2 + $0x50] sm:$0xff]  ;;  %v566_v61 = vld [vmem:[#allocation2 + $0x41] sm:$0xff] }
 0x123   : > { %483 = vrot.lane.b32.xlu1 %v466_v54, %s2107_s13  ;;  %485 = vrot.lane.b32.xlu0 %v467_v55, %s2107_s13  ;;  %v2465_v57 = vld [vmem:[#allocation2 + $0x60] sm:$0xff]  ;;  %413 = vst.msk [vmem:[#allocation4 + $0x28] sm:$0xff] %vm363_vm0, %v2461_v56  ;;  %v714_v1 = vld [vmem:[#allocation2 + $0x51] sm:$0xff] }
 0x124   : > { %414 = vst.msk [vmem:[#allocation4 + $0x30] sm:$0xff] %vm363_vm0, %v2465_v57  ;;  %v615_v62 = vld [vmem:[#allocation2 + $0x42] sm:$0xff]  ;;  %v763_v6 = vld [vmem:[#allocation2 + $0x52] sm:$0xff] }
 0x125   : > { %v482_v58 = vpop.permute.xlu0 %481  ;;  %v422_v5 = vld [vmem:[#allocation2 + $0x61] sm:$0xff]  ;;  %v2534_v14 = vpop.permute.xlu1 %741 }
 0x126   : > { %506 = vst.msk [vmem:[#allocation4] sm:$0xff] %vm505_vm4, %v482_v58  ;;  %v2472_v60 = vld [vmem:[#allocation2 + $0x70] sm:$0xff]  ;;  %v471_v8 = vld [vmem:[#allocation2 + $0x62] sm:$0xff] }
 0x127   : > { %487 = vrot.lane.b32.xlu1 %v468_v59, %s2107_s13  ;;  %530 = vrot.lane.b32.xlu0 %v514_v42, %s2109_s15  ;;  %415 = vst.msk [vmem:[#allocation4 + $0x38] sm:$0xff] %vm363_vm0, %v2472_v60  ;;  %v423_v7 = vld [vmem:[#allocation2 + $0x71] sm:$0xff]  ;;  %v521_v10 = vld [vmem:[#allocation2 + $0x80] sm:$0xff]  ;;  %vm1031_vm0 = vcmask 130112  }
 0x128   : > { %v472_v9 = vld [vmem:[#allocation2 + $0x72] sm:$0xff]  ;;  %v570_v11 = vld [vmem:[#allocation2 + $0x81] sm:$0xff] }
 0x129   : > { %v619_v12 = vld [vmem:[#allocation2 + $0x82] sm:$0xff] }
 0x12b   : > { %532 = vrot.lane.b32.xlu1 %v515_v50, %s2109_s15  ;;  %534 = vrot.lane.b32.xlu0 %v516_v44, %s2109_s15 }
 0x12f   : > { %536 = vrot.lane.b32.xlu1 %v517_v52, %s2109_s15  ;;  %579 = vrot.lane.b32.xlu0 %v417_v41, %s2110_s30 }
 0x133   : > { %581 = vrot.lane.b32.xlu1 %v418_v49, %s2110_s30  ;;  %583 = vrot.lane.b32.xlu0 %v419_v45, %s2110_s30 }
 0x137   : > { %585 = vrot.lane.b32.xlu1 %v566_v61, %s2110_s30  ;;  %628 = vrot.lane.b32.xlu0 %v466_v54, %s2111_s9 }
 0x13b   : > { %630 = vrot.lane.b32.xlu1 %v467_v55, %s2111_s9  ;;  %632 = vrot.lane.b32.xlu0 %v468_v59, %s2111_s9 }
 0x13f   : > { %634 = vrot.lane.b32.xlu1 %v615_v62, %s2111_s9  ;;  %678 = vrot.lane.b32.xlu0 %v515_v50, %s2106_s11 }
 0x143   : > { %680 = vrot.lane.b32.xlu1 %v516_v44, %s2106_s11  ;;  %682 = vrot.lane.b32.xlu0 %v517_v52, %s2106_s11 }
 0x147   : > { %727 = vrot.lane.b32.xlu0 %v418_v49, %s2108_s8  ;;  %684 = vrot.lane.b32.xlu1 %v2461_v56, %s2106_s11 }
 0x14b   : > { %731 = vrot.lane.b32.xlu0 %v566_v61, %s2108_s8  ;;  %729 = vrot.lane.b32.xlu1 %v419_v45, %s2108_s8 }
 0x14f   : > { %776 = vrot.lane.b32.xlu0 %v467_v55, %s2112_s10  ;;  %733 = vrot.lane.b32.xlu1 %v714_v1, %s2108_s8 }
 0x153   : > { %440 = vrot.lane.b32.xlu0 %v566_v61, %s2105_s26  ;;  %778 = vrot.lane.b32.xlu1 %v468_v59, %s2112_s10 }
 0x157   : > { %780 = vrot.lane.b32.xlu0 %v615_v62, %s2112_s10  ;;  %442 = vrot.lane.b32.xlu1 %v714_v1, %s2105_s26 }
 0x15b   : > { %444 = vrot.lane.b32.xlu0 %v422_v5, %s2105_s26  ;;  %782 = vrot.lane.b32.xlu1 %v763_v6, %s2112_s10 }
 0x15f   : > { %489 = vrot.lane.b32.xlu0 %v615_v62, %s2107_s13  ;;  %446 = vrot.lane.b32.xlu1 %v423_v7, %s2105_s26  ;;  %s1551_s26 = sshll.u32 %s296_s17, 4  ;;  %s2838_s26 = int_to_ptr.vmem [resolvable:$true] %s1551_s26 }
 0x163   : > { %493 = vrot.lane.b32.xlu0 %v471_v8, %s2107_s13  ;;  %491 = vrot.lane.b32.xlu1 %v763_v6, %s2107_s13 }
 0x167   : > { %538 = vrot.lane.b32.xlu0 %v2461_v56, %s2109_s15  ;;  %495 = vrot.lane.b32.xlu1 %v472_v9, %s2107_s13 }
 0x16b   : > { %542 = vrot.lane.b32.xlu0 %v2472_v60, %s2109_s15  ;;  %540 = vrot.lane.b32.xlu1 %v2465_v57, %s2109_s15 }
 0x16f   : > { %587 = vrot.lane.b32.xlu0 %v714_v1, %s2110_s30  ;;  %544 = vrot.lane.b32.xlu1 %v521_v10, %s2109_s15  ;;  %s2835_s15 = scalar_lea.hbm %s2890_s5, %s1711_s24 }
 0x173   : > { %591 = vrot.lane.b32.xlu0 %v423_v7, %s2110_s30  ;;  %589 = vrot.lane.b32.xlu1 %v422_v5, %s2110_s30 }
 0x177   : > { %636 = vrot.lane.b32.xlu0 %v763_v6, %s2111_s9  ;;  %593 = vrot.lane.b32.xlu1 %v570_v11, %s2110_s30 }
 0x17b   : > { %640 = vrot.lane.b32.xlu0 %v472_v9, %s2111_s9  ;;  %638 = vrot.lane.b32.xlu1 %v471_v8, %s2111_s9 }
 0x17f   : > { %686 = vrot.lane.b32.xlu0 %v2465_v57, %s2106_s11  ;;  %642 = vrot.lane.b32.xlu1 %v619_v12, %s2111_s9  ;;  %s2117_s9 = smov [#allocation15]  }
 0x183   : > { %690 = vrot.lane.b32.xlu0 %v521_v10, %s2106_s11  ;;  %688 = vrot.lane.b32.xlu1 %v2472_v60, %s2106_s11 }
 0x187   : > { %735 = vrot.lane.b32.xlu0 %v422_v5, %s2108_s8  ;;  %737 = vrot.lane.b32.xlu1 %v423_v7, %s2108_s8 }
 0x18b   : > { %739 = vrot.lane.b32.xlu0 %v570_v11, %s2108_s8  ;;  %786 = vrot.lane.b32.xlu1 %v472_v9, %s2112_s10 }
 0x18d   : > { %v435_v16 = vpop.permute.xlu1 %434 }
 0x18e   : > { %458 = vst.msk [vmem:[#allocation4 + $0x8] sm:$0xff] %vm456_vm3, %v435_v16 }
 0x18f   : > { %784 = vrot.lane.b32.xlu0 %v471_v8, %s2112_s10  ;;  %790 = vrot.lane.b32.xlu1 %v767_v15, %s2112_s10 }
 0x191   : > { %v439_v17 = vpop.permute.xlu1 %438  ;;  %v437_v18 = vpop.permute.xlu0 %436 }
 0x192   : > { %460 = vst.msk [vmem:[#allocation4 + $0x18] sm:$0xff] %vm456_vm3, %v439_v17  ;;  %459 = vst.msk [vmem:[#allocation4 + $0x10] sm:$0xff] %vm456_vm3, %v437_v18 }
 0x193   : > { %788 = vrot.lane.b32.xlu0 %v619_v12, %s2112_s10 }
 0x195   : > { %v484_v19 = vpop.permute.xlu1 %483  ;;  %v486_v20 = vpop.permute.xlu0 %485 }
 0x196   : > { %507 = vst.msk [vmem:[#allocation4 + $0x8] sm:$0xff] %vm505_vm4, %v484_v19  ;;  %508 = vst.msk [vmem:[#allocation4 + $0x10] sm:$0xff] %vm505_vm4, %v486_v20 }
 0x199   : > { %v488_v21 = vpop.permute.xlu1 %487  ;;  %v531_v22 = vpop.permute.xlu0 %530 }
 0x19a   : > { %509 = vst.msk [vmem:[#allocation4 + $0x18] sm:$0xff] %vm505_vm4, %v488_v21 }
 0x19b   : > { %555 = vst.msk [vmem:[#allocation4] sm:$0xff] %vm554_vm6, %v531_v22 }
 0x19d   : > { %v533_v23 = vpop.permute.xlu1 %532  ;;  %v535_v24 = vpop.permute.xlu0 %534 }
 0x19e   : > { %556 = vst.msk [vmem:[#allocation4 + $0x8] sm:$0xff] %vm554_vm6, %v533_v23  ;;  %557 = vst.msk [vmem:[#allocation4 + $0x10] sm:$0xff] %vm554_vm6, %v535_v24 }
 0x1a1   : > { %v537_v25 = vpop.permute.xlu1 %536  ;;  %v580_v26 = vpop.permute.xlu0 %579 }
 0x1a2   : > { %558 = vst.msk [vmem:[#allocation4 + $0x18] sm:$0xff] %vm554_vm6, %v537_v25  ;;  %v991_v25 = vld [vmem:[#allocation3 + $0x1] sm:$0xff] }
 0x1a3   : > { %604 = vst.msk [vmem:[#allocation4] sm:$0xff] %vm603_vm7, %v580_v26  ;;  %v1244_v26 = vld [vmem:[#allocation3 + $0x90] sm:$0xff]  ;;  %1007 = vrot.lane.b32.xlu0 %v991_v25, %s2107_s13 }
 0x1a4   : > { %1267 = vrot.lane.b32.xlu1 %v1244_v26, %s2113_s12 }
 0x1a5   : > { %v582_v27 = vpop.permute.xlu1 %581  ;;  %v584_v28 = vpop.permute.xlu0 %583 }
 0x1a6   : > { %605 = vst.msk [vmem:[#allocation4 + $0x8] sm:$0xff] %vm603_vm7, %v582_v27  ;;  %606 = vst.msk [vmem:[#allocation4 + $0x10] sm:$0xff] %vm603_vm7, %v584_v28  ;;  %v1040_v27 = vld [vmem:[#allocation3 + $0x2] sm:$0xff]  ;;  %v1293_v28 = vld [vmem:[#allocation3 + $0x91] sm:$0xff] }
 0x1a7   : > { %1056 = vrot.lane.b32.xlu0 %v1040_v27, %s2110_s30  ;;  %v1342_v27 = vld [vmem:[#allocation3 + $0x92] sm:$0xff] }
 0x1a8   : > { %1316 = vrot.lane.b32.xlu1 %v1293_v28, %s2114_s16 }
 0x1a9   : > { %v586_v29 = vpop.permute.xlu1 %585  ;;  %v629_v30 = vpop.permute.xlu0 %628 }
 0x1aa   : > { %607 = vst.msk [vmem:[#allocation4 + $0x18] sm:$0xff] %vm603_vm7, %v586_v29  ;;  %v975_v29 = vld [vmem:[#allocation3] sm:$0xff] }
 0x1ab   : > { %653 = vst.msk [vmem:[#allocation4] sm:$0xff] %vm652_vm8, %v629_v30 }
 0x1ac   : > { %983 = vst.msk [vmem:[#allocation5] sm:$0xff] %vm938_vm13, %v975_v29 }
 0x1ad   : > { %v631_v31 = vpop.permute.xlu1 %630  ;;  %v633_v32 = vpop.permute.xlu0 %632 }
 0x1ae   : > { %654 = vst.msk [vmem:[#allocation4 + $0x8] sm:$0xff] %vm652_vm8, %v631_v31  ;;  %655 = vst.msk [vmem:[#allocation4 + $0x10] sm:$0xff] %vm652_vm8, %v633_v32  ;;  %v2662_v31 = vld [vmem:[#allocation11] ss:$0 sm:$0xff] }
 0x1b1   : > { %v635_v33 = vpop.permute.xlu1 %634  ;;  %v679_v34 = vpop.permute.xlu0 %678 }
 0x1b2   : > { %656 = vst.msk [vmem:[#allocation4 + $0x18] sm:$0xff] %vm652_vm8, %v635_v33 }
 0x1b3   : > { %703 = vst.msk [vmem:[#allocation4] sm:$0xff] %vm702_vm9, %v679_v34 }
 0x1b5   : > { %v681_v35 = vpop.permute.xlu1 %680  ;;  %v683_v36 = vpop.permute.xlu0 %682 }
 0x1b6   : > { %704 = vst.msk [vmem:[#allocation4 + $0x8] sm:$0xff] %vm702_vm9, %v681_v35  ;;  %705 = vst.msk [vmem:[#allocation4 + $0x10] sm:$0xff] %vm702_vm9, %v683_v36 }
 0x1b9   : > { %v685_v37 = vpop.permute.xlu1 %684  ;;  %v728_v38 = vpop.permute.xlu0 %727 }
 0x1ba   : > { %706 = vst.msk [vmem:[#allocation4 + $0x18] sm:$0xff] %vm702_vm9, %v685_v37 }
 0x1bb   : > { %752 = vst.msk [vmem:[#allocation4] sm:$0xff] %vm751_vm10, %v728_v38 }
 0x1bd   : > { %v730_v39 = vpop.permute.xlu1 %729  ;;  %v732_v40 = vpop.permute.xlu0 %731 }
 0x1be   : > { %753 = vst.msk [vmem:[#allocation4 + $0x8] sm:$0xff] %vm751_vm10, %v730_v39  ;;  %754 = vst.msk [vmem:[#allocation4 + $0x10] sm:$0xff] %vm751_vm10, %v732_v40 }
 0x1c1   : > { %v734_v41 = vpop.permute.xlu1 %733  ;;  %v777_v42 = vpop.permute.xlu0 %776 }
 0x1c2   : > { %755 = vst.msk [vmem:[#allocation4 + $0x18] sm:$0xff] %vm751_vm10, %v734_v41 }
 0x1c3   : > { %801 = vst.msk [vmem:[#allocation4] sm:$0xff] %vm800_vm11, %v777_v42 }
 0x1c5   : > { %v779_v43 = vpop.permute.xlu1 %778  ;;  %v441_v44 = vpop.permute.xlu0 %440 }
 0x1c6   : > { %802 = vst.msk [vmem:[#allocation4 + $0x8] sm:$0xff] %vm800_vm11, %v779_v43 }
 0x1c7   : > { %461 = vst.msk [vmem:[#allocation4 + $0x20] sm:$0xff] %vm456_vm3, %v441_v44 }
 0x1c9   : > { %v443_v45 = vpop.permute.xlu1 %442  ;;  %v781_v46 = vpop.permute.xlu0 %780 }
 0x1ca   : > { %462 = vst.msk [vmem:[#allocation4 + $0x28] sm:$0xff] %vm456_vm3, %v443_v45  ;;  %v809_v49 = vld [vmem:[#allocation4] sm:$0xff] }
 0x1cb   : > { %803 = vst.msk [vmem:[#allocation4 + $0x10] sm:$0xff] %vm800_vm11, %v781_v46 }
 0x1cd   : > { %v783_v47 = vpop.permute.xlu1 %782  ;;  %v445_v48 = vpop.permute.xlu0 %444  ;;  %v810_v50 = vld [vmem:[#allocation4 + $0x8] sm:$0xff] }
 0x1ce   : > { %804 = vst.msk [vmem:[#allocation4 + $0x18] sm:$0xff] %vm800_vm11, %v783_v47  ;;  %v817_v51 = vpack.c.bf16 %v810_v50, %v809_v49 }
 0x1cf   : > { %463 = vst.msk [vmem:[#allocation4 + $0x30] sm:$0xff] %vm456_vm3, %v445_v48 }
 0x1d0   : > { %1734 = vmatprep.mubr.msk.bf16.mxu0 %vm848_vm12, %v817_v51 }
 0x1d1   : > { %v447_v52 = vpop.permute.xlu1 %446  ;;  %v490_v53 = vpop.permute.xlu0 %489 }
 0x1d2   : > { %464 = vst.msk [vmem:[#allocation4 + $0x38] sm:$0xff] %vm456_vm3, %v447_v52  ;;  %v811_v56 = vld [vmem:[#allocation4 + $0x10] sm:$0xff]  ;;  %vm1129_vm3 = vcmask 261312  }
 0x1d3   : > { %510 = vst.msk [vmem:[#allocation4 + $0x20] sm:$0xff] %vm505_vm4, %v490_v53 }
 0x1d5   : > { %v492_v54 = vpop.permute.xlu1 %491  ;;  %v494_v55 = vpop.permute.xlu0 %493  ;;  %v812_v57 = vld [vmem:[#allocation4 + $0x18] sm:$0xff] }
 0x1d6   : > { %511 = vst.msk [vmem:[#allocation4 + $0x28] sm:$0xff] %vm505_vm4, %v492_v54  ;;  %512 = vst.msk [vmem:[#allocation4 + $0x30] sm:$0xff] %vm505_vm4, %v494_v55  ;;  %v818_v58 = vpack.c.bf16 %v812_v57, %v811_v56 }
 0x1d8   : > { %1735 = vmatmul.mubr.msk.bf16.vlgmr.msra.gmra.mrb[0].mxu0 %vm848_vm12, %v818_v58 }
 0x1d9   : > { %v496_v59 = vpop.permute.xlu1 %495  ;;  %v539_v60 = vpop.permute.xlu0 %538 }
 0x1da   : > { %513 = vst.msk [vmem:[#allocation4 + $0x38] sm:$0xff] %vm505_vm4, %v496_v59  ;;  %vm1178_vm4 = vcmask 326912  }
 0x1db   : > { %559 = vst.msk [vmem:[#allocation4 + $0x20] sm:$0xff] %vm554_vm6, %v539_v60 }
 0x1dd   : > { %v541_v61 = vpop.permute.xlu1 %540  ;;  %v543_v62 = vpop.permute.xlu0 %542 }
 0x1de   : > { %560 = vst.msk [vmem:[#allocation4 + $0x28] sm:$0xff] %vm554_vm6, %v541_v61  ;;  %561 = vst.msk [vmem:[#allocation4 + $0x30] sm:$0xff] %vm554_vm6, %v543_v62 }
 0x1e1   : > { %v545_v63 = vpop.permute.xlu1 %544  ;;  %v588_v1 = vpop.permute.xlu0 %587 }
 0x1e2   : > { %562 = vst.msk [vmem:[#allocation4 + $0x38] sm:$0xff] %vm554_vm6, %v545_v63  ;;  %vm1277_vm6 = vcmask 458112  }
 0x1e3   : > { %608 = vst.msk [vmem:[#allocation4 + $0x20] sm:$0xff] %vm603_vm7, %v588_v1 }
 0x1e5   : > { %v590_v2 = vpop.permute.xlu1 %589  ;;  %v592_v3 = vpop.permute.xlu0 %591 }
 0x1e6   : > { %609 = vst.msk [vmem:[#allocation4 + $0x28] sm:$0xff] %vm603_vm7, %v590_v2  ;;  %610 = vst.msk [vmem:[#allocation4 + $0x30] sm:$0xff] %vm603_vm7, %v592_v3 }
 0x1e9   : > { %v594_v4 = vpop.permute.xlu1 %593  ;;  %v637_v5 = vpop.permute.xlu0 %636 }
 0x1ea   : > { %611 = vst.msk [vmem:[#allocation4 + $0x38] sm:$0xff] %vm603_vm7, %v594_v4  ;;  %vm1326_vm7 = vcmask 523712  }
 0x1eb   : > { %657 = vst.msk [vmem:[#allocation4 + $0x20] sm:$0xff] %vm652_vm8, %v637_v5 }
 0x1ed   : > { %v639_v6 = vpop.permute.xlu1 %638  ;;  %v641_v7 = vpop.permute.xlu0 %640 }
 0x1ee   : > { %658 = vst.msk [vmem:[#allocation4 + $0x28] sm:$0xff] %vm652_vm8, %v639_v6  ;;  %659 = vst.msk [vmem:[#allocation4 + $0x30] sm:$0xff] %vm652_vm8, %v641_v7 }
 0x1f1   : > { %v643_v8 = vpop.permute.xlu1 %642  ;;  %v687_v9 = vpop.permute.xlu0 %686 }
 0x1f2   : > { %660 = vst.msk [vmem:[#allocation4 + $0x38] sm:$0xff] %vm652_vm8, %v643_v8  ;;  %vm1375_vm8 = vcmask 589312  }
 0x1f3   : > { %707 = vst.msk [vmem:[#allocation4 + $0x20] sm:$0xff] %vm702_vm9, %v687_v9  ;;  %710 = vst.msk [vmem:[#allocation4 + $0x38] sm:$0xff] %vm702_vm9, %v2527_v13 }
 0x1f4   : > { %759 = vst.msk [vmem:[#allocation4 + $0x38] sm:$0xff] %vm751_vm10, %v2534_v14 }
 0x1f5   : > { %v689_v10 = vpop.permute.xlu1 %688  ;;  %v691_v11 = vpop.permute.xlu0 %690 }
 0x1f6   : > { %708 = vst.msk [vmem:[#allocation4 + $0x28] sm:$0xff] %vm702_vm9, %v689_v10  ;;  %709 = vst.msk [vmem:[#allocation4 + $0x30] sm:$0xff] %vm702_vm9, %v691_v11  ;;  %v1871_v10 = vld [vmem:[#allocation12] sm:$0xff]   ;;  %v1872_v11 = vld [vmem:[#allocation12 + $0x8] sm:$0xff]   ;;  %vm1439_vm9 = vcmask 588800  }
 0x1f7   : > { %1742 = vmatprep.subr.bf16.mxu1 %v1871_v10 }
 0x1f8   : > { %1743 = vmatpush3.bf16.msra.mxu1 %v1871_v10 }
 0x1f9   : > { %v738_v12 = vpop.permute.xlu1 %737  ;;  %v736_v15 = vpop.permute.xlu0 %735  ;;  %1744 = vmatprep.subr.bf16.mxu1 %v1872_v11 }
 0x1fa   : > { %757 = vst.msk [vmem:[#allocation4 + $0x28] sm:$0xff] %vm751_vm10, %v738_v12  ;;  %756 = vst.msk [vmem:[#allocation4 + $0x20] sm:$0xff] %vm751_vm10, %v736_v15  ;;  %v1873_v12 = vld [vmem:[#allocation12 + $0x10] sm:$0xff]   ;;  %v1874_v15 = vld [vmem:[#allocation12 + $0x18] sm:$0xff]  }
 0x1fc   : > { %1745 = vmatpush3.bf16.msra.mxu1 %v1872_v11 }
 0x1fd   : > { %v787_v16 = vpop.permute.xlu1 %786  ;;  %v740_v17 = vpop.permute.xlu0 %739  ;;  %1746 = vmatprep.subr.bf16.mxu1 %v1873_v12 }
 0x1fe   : > { %806 = vst.msk [vmem:[#allocation4 + $0x28] sm:$0xff] %vm800_vm11, %v787_v16 }
 0x1ff   : > { %758 = vst.msk [vmem:[#allocation4 + $0x30] sm:$0xff] %vm751_vm10, %v740_v17  ;;  %v1875_v17 = vld [vmem:[#allocation12 + $0x20] ss:$0 sps:$4 sm:$0xff]  }
 0x200   : > { %1747 = vmatpush3.bf16.msra.mxu1 %v1873_v12 }
 0x201   : > { %v785_v13 = vpop.permute.xlu0 %784  ;;  %v791_v14 = vpop.permute.xlu1 %790  ;;  %1748 = vmatprep.subr.bf16.mxu1 %v1874_v15 }
 0x202   : > { %805 = vst.msk [vmem:[#allocation4 + $0x20] sm:$0xff] %vm800_vm11, %v785_v13  ;;  %808 = vst.msk [vmem:[#allocation4 + $0x38] sm:$0xff] %vm800_vm11, %v791_v14  ;;  %v1454_v13 = vsel %vm1452_vm2, %v1875_v17, 0 }
 0x204   : > { %1749 = vmatpush3.bf16.msra.mxu1 %v1874_v15 }
 0x205   : > { %v789_v18 = vpop.permute.xlu0 %788  ;;  %v814_v20 = vld [vmem:[#allocation4 + $0x28] sm:$0xff]  ;;  %1761 = vmatprep.subr.msk.bf16.mxu1 %vm1452_vm2, %v1875_v17 }
 0x206   : > { %807 = vst.msk [vmem:[#allocation4 + $0x30] sm:$0xff] %vm800_vm11, %v789_v18 }
 0x208   : > { %1751 = vmatpush3.bf16.msra.mxu1 %v1454_v13 }
 0x209   : > { %v813_v19 = vld [vmem:[#allocation4 + $0x20] sm:$0xff]  ;;  %v816_v22 = vld [vmem:[#allocation4 + $0x38] sm:$0xff] }
 0x20a   : > { %v819_v21 = vpack.c.bf16 %v814_v20, %v813_v19 }
 0x20c   : > { %1738 = vmatprep.mubr.msk.bf16.mxu0 %vm848_vm12, %v819_v21 }
 0x20d   : > { %v815_v23 = vld [vmem:[#allocation4 + $0x30] sm:$0xff] }
 0x20e   : > { %v820_v24 = vpack.c.bf16 %v816_v22, %v815_v23 }
 0x210   : > { %1739 = vmatmul.mubr.msk.bf16.gmra.mrb[4].mxu0 %vm848_vm12, %v820_v24 }
 0x215   : > { %v1008_v30 = vpop.permute.xlu0 %1007 }
 0x216   : > { %1032 = vst.msk [vmem:[#allocation5] sm:$0xff] %vm1031_vm0, %v1008_v30  ;;  %v2738_v22 = vpop.permute.xlu1 %1267 }
 0x219   : > { %v1057_v0 = vpop.permute.xlu0 %1056 }
 0x21a   : > { %1081 = vst.msk [vmem:[#allocation5] sm:$0xff] %vm1080_vm1, %v1057_v0  ;;  %v2744_v24 = vpop.permute.xlu1 %1316 }
 0x2ab   : > { %v1736_v32 = vpop.f32.mrb[0].mxu0 }
 0x2ac   : > { %v908_v33 = vadd.f32 %v1736_v32, %v2662_v31  ;;  %v899_v34 = vpop.f32.mrb[1].mxu0 }
 0x2ad   : > { %v900_v35 = vadd.f32 %v2662_v31, %v899_v34  ;;  %v1737_v36 = vpop.f32.mrb[2].mxu0 }
 0x2ae   : > { %v932_v37 = vmax.f32 %v908_v33, 0.0  ;;  %v911_v38 = vadd.f32 %v1737_v36, %v2662_v31  ;;  %v902_v39 = vpop.f32.mrb[3].mxu0 }
 0x2af   : > { %v930_v40 = vmax.f32 %v900_v35, 0.0  ;;  %v903_v41 = vadd.f32 %v2662_v31, %v902_v39 }
 0x2b0   : > { %969 = vst.msk [vmem:[#allocation3 + $0x31] sm:$0xff] %vm938_vm13, %v932_v37  ;;  %v933_v42 = vmax.f32 %v911_v38, 0.0 }
 0x2b1   : > { %967 = vst.msk [vmem:[#allocation3 + $0x11] sm:$0xff] %vm938_vm13, %v930_v40  ;;  %v931_v43 = vmax.f32 %v903_v41, 0.0 }
 0x2b2   : > { %970 = vst.msk [vmem:[#allocation3 + $0x41] sm:$0xff] %vm938_vm13, %v933_v42 }
 0x2b3   : > { %968 = vst.msk [vmem:[#allocation3 + $0x21] sm:$0xff] %vm938_vm13, %v931_v43 }
 0x2b7   : > { %v1091_v44 = vld [vmem:[#allocation3 + $0x30] sm:$0xff] }
 0x2b8   : > { %v994_v45 = vld [vmem:[#allocation3 + $0x31] sm:$0xff]  ;;  %1109 = vrot.lane.b32.xlu0 %v1091_v44, %s2106_s11  ;;  %986 = vst.msk [vmem:[#allocation5 + $0x18] sm:$0xff] %vm938_vm13, %v1091_v44 }
 0x2b9   : > { %1013 = vrot.lane.b32.xlu1 %v994_v45, %s2107_s13  ;;  %v1089_v46 = vld [vmem:[#allocation3 + $0x10] sm:$0xff]  ;;  %v1239_v47 = vld [vmem:[#allocation3 + $0x40] sm:$0xff] }
 0x2ba   : > { %984 = vst.msk [vmem:[#allocation5 + $0x8] sm:$0xff] %vm938_vm13, %v1089_v46  ;;  %v1090_v48 = vld [vmem:[#allocation3 + $0x20] sm:$0xff]  ;;  %987 = vst.msk [vmem:[#allocation5 + $0x20] sm:$0xff] %vm938_vm13, %v1239_v47  ;;  %v1043_v49 = vld [vmem:[#allocation3 + $0x32] sm:$0xff] }
 0x2bb   : > { %985 = vst.msk [vmem:[#allocation5 + $0x10] sm:$0xff] %vm938_vm13, %v1090_v48  ;;  %v1138_v50 = vld [vmem:[#allocation3 + $0x11] sm:$0xff]  ;;  %v1288_v52 = vld [vmem:[#allocation3 + $0x41] sm:$0xff] }
 0x2bc   : > { %1158 = vrot.lane.b32.xlu0 %v994_v45, %s2112_s10  ;;  %v1187_v51 = vld [vmem:[#allocation3 + $0x12] sm:$0xff]  ;;  %v1337_v53 = vld [vmem:[#allocation3 + $0x42] sm:$0xff] }
 0x2bd   : > { %1062 = vrot.lane.b32.xlu1 %v1043_v49, %s2110_s30  ;;  %v993_v55 = vld [vmem:[#allocation3 + $0x21] sm:$0xff] }
 0x2be   : > { %v1042_v2 = vld [vmem:[#allocation3 + $0x22] sm:$0xff] }
 0x2c0   : > { %1207 = vrot.lane.b32.xlu0 %v1043_v49, %s2115_s6 }
 0x2c1   : > { %1255 = vrot.lane.b32.xlu1 %v1091_v44, %s2113_s12 }
 0x2c4   : > { %1105 = vrot.lane.b32.xlu0 %v1089_v46, %s2106_s11 }
 0x2c5   : > { %1304 = vrot.lane.b32.xlu1 %v994_v45, %s2114_s16 }
 0x2c8   : > { %1154 = vrot.lane.b32.xlu0 %v1138_v50, %s2112_s10 }
 0x2c9   : > { %1353 = vrot.lane.b32.xlu1 %v1043_v49, %s2116_s29 }
 0x2cc   : > { %1203 = vrot.lane.b32.xlu0 %v1187_v51, %s2115_s6 }
 0x2cd   : > { %1009 = vrot.lane.b32.xlu1 %v1138_v50, %s2107_s13 }
 0x2d0   : > { %1257 = vrot.lane.b32.xlu0 %v1239_v47, %s2113_s12 }
 0x2d1   : > { %1058 = vrot.lane.b32.xlu1 %v1187_v51, %s2110_s30 }
 0x2d4   : > { %1306 = vrot.lane.b32.xlu0 %v1288_v52, %s2114_s16 }
 0x2d5   : > { %1111 = vrot.lane.b32.xlu1 %v1239_v47, %s2106_s11 }
 0x2d8   : > { %1015 = vrot.lane.b32.xlu0 %v1288_v52, %s2107_s13 }
 0x2d9   : > { %1160 = vrot.lane.b32.xlu1 %v1288_v52, %s2112_s10 }
 0x2dc   : > { %1355 = vrot.lane.b32.xlu0 %v1337_v53, %s2116_s29 }
 0x2dd   : > { %1209 = vrot.lane.b32.xlu1 %v1337_v53, %s2115_s6 }
 0x2e0   : > { %1064 = vrot.lane.b32.xlu0 %v1337_v53, %s2110_s30 }
 0x2e1   : > { %1107 = vrot.lane.b32.xlu1 %v1090_v48, %s2106_s11 }
 0x2e3   : > { %v1740_v54 = vpop.f32.mrb[4].mxu0 }
 0x2e4   : > { %v924_v56 = vadd.f32 %v1740_v54, %v2662_v31  ;;  %1011 = vrot.lane.b32.xlu0 %v993_v55, %s2107_s13  ;;  %v915_v57 = vpop.f32.mrb[5].mxu0 }
 0x2e5   : > { %1156 = vrot.lane.b32.xlu1 %v993_v55, %s2112_s10  ;;  %v916_v58 = vadd.f32 %v2662_v31, %v915_v57  ;;  %v1741_v59 = vpop.f32.mrb[6].mxu0 }
 0x2e6   : > { %v936_v60 = vmax.f32 %v924_v56, 0.0  ;;  %v927_v61 = vadd.f32 %v1741_v59, %v2662_v31  ;;  %v918_v62 = vpop.f32.mrb[7].mxu0 }
 0x2e7   : > { %v934_v63 = vmax.f32 %v916_v58, 0.0  ;;  %v919_v1 = vadd.f32 %v2662_v31, %v918_v62 }
 0x2e8   : > { %973 = vst.msk [vmem:[#allocation3 + $0x71] sm:$0xff] %vm938_vm13, %v936_v60  ;;  %v937_v3 = vmax.f32 %v927_v61, 0.0  ;;  %1060 = vrot.lane.b32.xlu0 %v1042_v2, %s2110_s30 }
 0x2e9   : > { %1205 = vrot.lane.b32.xlu1 %v1042_v2, %s2115_s6  ;;  %971 = vst.msk [vmem:[#allocation3 + $0x51] sm:$0xff] %vm938_vm13, %v934_v63  ;;  %v935_v4 = vmax.f32 %v919_v1, 0.0 }
 0x2ea   : > { %974 = vst.msk [vmem:[#allocation3 + $0x81] sm:$0xff] %vm938_vm13, %v937_v3 }
 0x2eb   : > { %972 = vst.msk [vmem:[#allocation3 + $0x61] sm:$0xff] %vm938_vm13, %v935_v4 }
 0x2ec   : > { %1253 = vrot.lane.b32.xlu0 %v1090_v48, %s2113_s12 }
 0x2ef   : > { %v998_v5 = vld [vmem:[#allocation3 + $0x71] sm:$0xff] }
 0x2f0   : > { %v1095_v6 = vld [vmem:[#allocation3 + $0x70] sm:$0xff]  ;;  %1302 = vrot.lane.b32.xlu0 %v993_v55, %s2114_s16  ;;  %1021 = vrot.lane.b32.xlu1 %v998_v5, %s2107_s13 }
 0x2f1   : > { %v1240_v7 = vld [vmem:[#allocation3 + $0x50] sm:$0xff]  ;;  %990 = vst.msk [vmem:[#allocation5 + $0x38] sm:$0xff] %vm938_vm13, %v1095_v6  ;;  %v1243_v18 = vld [vmem:[#allocation3 + $0x80] sm:$0xff] }
 0x2f2   : > { %988 = vst.msk [vmem:[#allocation5 + $0x28] sm:$0xff] %vm938_vm13, %v1240_v7  ;;  %v1241_v8 = vld [vmem:[#allocation3 + $0x60] sm:$0xff]  ;;  %v1047_v9 = vld [vmem:[#allocation3 + $0x72] sm:$0xff] }
 0x2f3   : > { %989 = vst.msk [vmem:[#allocation5 + $0x30] sm:$0xff] %vm938_vm13, %v1241_v8  ;;  %v1289_v16 = vld [vmem:[#allocation3 + $0x51] sm:$0xff]  ;;  %v1292_v19 = vld [vmem:[#allocation3 + $0x81] sm:$0xff] }
 0x2f4   : > { %1351 = vrot.lane.b32.xlu0 %v1042_v2, %s2116_s29  ;;  %1070 = vrot.lane.b32.xlu1 %v1047_v9, %s2110_s30  ;;  %v1191_v14 = vld [vmem:[#allocation3 + $0x52] sm:$0xff]  ;;  %v997_v20 = vld [vmem:[#allocation3 + $0x61] sm:$0xff] }
 0x2f5   : > { %v1046_v21 = vld [vmem:[#allocation3 + $0x62] sm:$0xff] }
 0x2f6   : > { %v1194_v23 = vld [vmem:[#allocation3 + $0x82] sm:$0xff] }
 0x2f8   : > { %1117 = vrot.lane.b32.xlu0 %v1095_v6, %s2106_s11  ;;  %1263 = vrot.lane.b32.xlu1 %v1095_v6, %s2113_s12 }
 0x2fc   : > { %1166 = vrot.lane.b32.xlu0 %v998_v5, %s2112_s10  ;;  %1312 = vrot.lane.b32.xlu1 %v998_v5, %s2114_s16 }
 0x300   : > { %1215 = vrot.lane.b32.xlu0 %v1047_v9, %s2115_s6  ;;  %1361 = vrot.lane.b32.xlu1 %v1047_v9, %s2116_s29 }
 0x304   : > { %1259 = vrot.lane.b32.xlu1 %v1240_v7, %s2113_s12  ;;  %1113 = vrot.lane.b32.xlu0 %v1240_v7, %s2106_s11 }
 0x308   : > { %1308 = vrot.lane.b32.xlu1 %v1289_v16, %s2114_s16  ;;  %1162 = vrot.lane.b32.xlu0 %v1289_v16, %s2112_s10 }
 0x30c   : > { %1211 = vrot.lane.b32.xlu0 %v1191_v14, %s2115_s6  ;;  %1017 = vrot.lane.b32.xlu1 %v1289_v16, %s2107_s13 }
 0x310   : > { %1265 = vrot.lane.b32.xlu0 %v1243_v18, %s2113_s12  ;;  %1357 = vrot.lane.b32.xlu1 %v1191_v14, %s2116_s29 }
 0x314   : > { %1314 = vrot.lane.b32.xlu0 %v1292_v19, %s2114_s16  ;;  %1066 = vrot.lane.b32.xlu1 %v1191_v14, %s2110_s30 }
 0x318   : > { %1019 = vrot.lane.b32.xlu0 %v997_v20, %s2107_s13  ;;  %1119 = vrot.lane.b32.xlu1 %v1243_v18, %s2106_s11 }
 0x31c   : > { %1068 = vrot.lane.b32.xlu0 %v1046_v21, %s2110_s30  ;;  %1168 = vrot.lane.b32.xlu1 %v1292_v19, %s2112_s10  ;;  %s2018_s30 = scalar_lea.vmem %s2838_s26, 1024 }
 0x31d   : > { %p2019_p3 = scmp.ne.s32.totalorder %s2838_s26, %s2018_s30 }
 0x31f   : > { %p2020_p5 = pnand %p2019_p3, %p2308_p10 }
 0x320   : > { %1261 = vrot.lane.b32.xlu0 %v1241_v8, %s2113_s12  ;;  %1217 = vrot.lane.b32.xlu1 %v1194_v23, %s2115_s6 }
 0x321   : > { %p2021_p7 = pneg %p2020_p5 }
 0x324   : > { %1310 = vrot.lane.b32.xlu0 %v997_v20, %s2114_s16  ;;  %1115 = vrot.lane.b32.xlu1 %v1241_v8, %s2106_s11 }
 0x328   : > { %1359 = vrot.lane.b32.xlu0 %v1046_v21, %s2116_s29  ;;  %1164 = vrot.lane.b32.xlu1 %v997_v20, %s2112_s10  ;;  %s2022_s10 = sshll.u32 %s2117_s9, 4  ;;  %s2023_s10 = int_to_ptr.vmem [resolvable:$false] %s2022_s10 }
 0x329   : > { %s2024_s12 = scalar_lea.vmem %s2023_s10, 2048  ;;  %p2025_p12 = scmp.lt.s32.totalorder %s2838_s26, %s2023_s10 }
 0x32a   : > { %v1110_v26 = vpop.permute.xlu0 %1109  ;;  %p2026_p2 = scmp.lt.s32.totalorder %s2024_s12, %s2018_s30 }
 0x32b   : > { %v1014_v25 = vpop.permute.xlu1 %1013 }
 0x32c   : > { %1035 = vst.msk [vmem:[#allocation5 + $0x18] sm:$0xff] %vm1031_vm0, %v1014_v25  ;;  %1363 = vrot.lane.b32.xlu0 %v1194_v23, %s2116_s29  ;;  %1213 = vrot.lane.b32.xlu1 %v1046_v21, %s2115_s6  ;;  %p2027_p1 = por %p2026_p2, %p2025_p12 }
 0x32e   : > { %v1159_v29 = vpop.permute.xlu0 %1158  ;;  %p2028_p13 = pnand %p2027_p1, %p2021_p7 }
 0x32f   : > { %v1063_v28 = vpop.permute.xlu1 %1062 }
 0x330   : > { %1084 = vst.msk [vmem:[#allocation5 + $0x18] sm:$0xff] %vm1080_vm1, %v1063_v28  ;;  %1365 = vrot.lane.b32.xlu1 %v1342_v27, %s2116_s29 }
 0x332   : > { %v1208_v0 = vpop.permute.xlu0 %1207 }
 0x333   : > { %v1256_v30 = vpop.permute.xlu1 %1255 }
 0x336   : > { %v1106_v32 = vpop.permute.xlu0 %1105 }
 0x337   : > { %v1305_v31 = vpop.permute.xlu1 %1304  ;;  %1130 = vst.msk [vmem:[#allocation5] sm:$0xff] %vm1129_vm3, %v1106_v32 }
 0x33a   : > { %v1155_v34 = vpop.permute.xlu0 %1154 }
 0x33b   : > { %v1354_v33 = vpop.permute.xlu1 %1353  ;;  %1179 = vst.msk [vmem:[#allocation5] sm:$0xff] %vm1178_vm4, %v1155_v34 }
 0x33e   : > { %v1204_v36 = vpop.permute.xlu0 %1203 }
 0x33f   : > { %v1010_v35 = vpop.permute.xlu1 %1009  ;;  %1228 = vst.msk [vmem:[#allocation5] sm:$0xff] %vm1227_vm5, %v1204_v36 }
 0x340   : > { %1033 = vst.msk [vmem:[#allocation5 + $0x8] sm:$0xff] %vm1031_vm0, %v1010_v35 }
 0x342   : > { %v1258_v38 = vpop.permute.xlu0 %1257 }
 0x343   : > { %v1059_v37 = vpop.permute.xlu1 %1058 }
 0x344   : > { %1082 = vst.msk [vmem:[#allocation5 + $0x8] sm:$0xff] %vm1080_vm1, %v1059_v37 }
 0x346   : > { %v1307_v40 = vpop.permute.xlu0 %1306 }
 0x347   : > { %v1112_v39 = vpop.permute.xlu1 %1111 }
 0x348   : > { %1133 = vst.msk [vmem:[#allocation5 + $0x18] sm:$0xff] %vm1129_vm3, %v1112_v39 }
 0x34a   : > { %v1016_v42 = vpop.permute.xlu0 %1015 }
 0x34b   : > { %v1161_v41 = vpop.permute.xlu1 %1160  ;;  %1036 = vst.msk [vmem:[#allocation5 + $0x20] sm:$0xff] %vm1031_vm0, %v1016_v42 }
 0x34c   : > { %1182 = vst.msk [vmem:[#allocation5 + $0x18] sm:$0xff] %vm1178_vm4, %v1161_v41 }
 0x34e   : > { %v1356_v44 = vpop.permute.xlu0 %1355 }
 0x34f   : > { %v1210_v43 = vpop.permute.xlu1 %1209 }
 0x350   : > { %1231 = vst.msk [vmem:[#allocation5 + $0x18] sm:$0xff] %vm1227_vm5, %v1210_v43 }
 0x352   : > { %v1065_v46 = vpop.permute.xlu0 %1064 }
 0x353   : > { %v1108_v45 = vpop.permute.xlu1 %1107  ;;  %1085 = vst.msk [vmem:[#allocation5 + $0x20] sm:$0xff] %vm1080_vm1, %v1065_v46 }
 0x354   : > { %1131 = vst.msk [vmem:[#allocation5 + $0x8] sm:$0xff] %vm1129_vm3, %v1108_v45 }
 0x356   : > { %v1012_v48 = vpop.permute.xlu0 %1011 }
 0x357   : > { %v1157_v47 = vpop.permute.xlu1 %1156  ;;  %1034 = vst.msk [vmem:[#allocation5 + $0x10] sm:$0xff] %vm1031_vm0, %v1012_v48 }
 0x358   : > { %1180 = vst.msk [vmem:[#allocation5 + $0x8] sm:$0xff] %vm1178_vm4, %v1157_v47 }
 0x35a   : > { %v1061_v50 = vpop.permute.xlu0 %1060 }
 0x35b   : > { %v1206_v49 = vpop.permute.xlu1 %1205  ;;  %1083 = vst.msk [vmem:[#allocation5 + $0x10] sm:$0xff] %vm1080_vm1, %v1061_v50 }
 0x35c   : > { %1229 = vst.msk [vmem:[#allocation5 + $0x8] sm:$0xff] %vm1227_vm5, %v1206_v49 }
 0x35d   : > { %1279 = vst.msk [vmem:[#allocation5 + $0x8] sm:$0xff] %vm1277_vm6, %v1256_v30 }
 0x35e   : > { %1132 = vst.msk [vmem:[#allocation5 + $0x10] sm:$0xff] %vm1129_vm3, %v1110_v26  ;;  %v1254_v51 = vpop.permute.xlu0 %1253 }
 0x35f   : > { %1328 = vst.msk [vmem:[#allocation5 + $0x8] sm:$0xff] %vm1326_vm7, %v1305_v31 }
 0x360   : > { %1181 = vst.msk [vmem:[#allocation5 + $0x10] sm:$0xff] %vm1178_vm4, %v1159_v29 }
 0x361   : > { %1377 = vst.msk [vmem:[#allocation5 + $0x8] sm:$0xff] %vm1375_vm8, %v1354_v33  ;;  %v1695_v33 = vld [vmem:[#allocation14] ss:$0 sm:$0xff] }
 0x362   : > { %1230 = vst.msk [vmem:[#allocation5 + $0x10] sm:$0xff] %vm1227_vm5, %v1208_v0  ;;  %v1022_v52 = vpop.permute.xlu1 %1021  ;;  %v1303_v53 = vpop.permute.xlu0 %1302 }
 0x363   : > { %1280 = vst.msk [vmem:[#allocation5 + $0x10] sm:$0xff] %vm1277_vm6, %v1258_v38  ;;  %1278 = vst.msk [vmem:[#allocation5] sm:$0xff] %vm1277_vm6, %v1254_v51 }
 0x364   : > { %1329 = vst.msk [vmem:[#allocation5 + $0x10] sm:$0xff] %vm1326_vm7, %v1307_v40  ;;  %1327 = vst.msk [vmem:[#allocation5] sm:$0xff] %vm1326_vm7, %v1303_v53 }
 0x365   : > { %1378 = vst.msk [vmem:[#allocation5 + $0x10] sm:$0xff] %vm1375_vm8, %v1356_v44 }
 0x366   : > { %1039 = vst.msk [vmem:[#allocation5 + $0x38] sm:$0xff] %vm1031_vm0, %v1022_v52  ;;  %v1071_v54 = vpop.permute.xlu1 %1070  ;;  %v1352_v55 = vpop.permute.xlu0 %1351 }
 0x367   : > { %1088 = vst.msk [vmem:[#allocation5 + $0x38] sm:$0xff] %vm1080_vm1, %v1071_v54 }
 0x368   : > { %1376 = vst.msk [vmem:[#allocation5] sm:$0xff] %vm1375_vm8, %v1352_v55  ;;  %v1385_v61 = vld [vmem:[#allocation5 + $0x8] sm:$0xff] }
 0x36a   : > { %v2782_v56 = vpop.permute.xlu1 %1263  ;;  %v1118_v57 = vpop.permute.xlu0 %1117 }
 0x36c   : > { %v1386_v16 = vld [vmem:[#allocation5 + $0x10] sm:$0xff] }
 0x36e   : > { %v2784_v58 = vpop.permute.xlu1 %1312  ;;  %v1167_v59 = vpop.permute.xlu0 %1166 }
 0x36f   : > { %v1384_v60 = vld [vmem:[#allocation5] sm:$0xff] }
 0x370   : > { %v1392_v62 = vpack.c.bf16 %v1385_v61, %v1384_v60 }
 0x372   : > { %1752 = vmatprep.mubr.msk.bf16.mxu1 %vm1439_vm9, %v1392_v62  ;;  %v1362_v63 = vpop.permute.xlu1 %1361  ;;  %v1216_v1 = vpop.permute.xlu0 %1215 }
 0x376   : > { %v1260_v2 = vpop.permute.xlu1 %1259  ;;  %v1114_v3 = vpop.permute.xlu0 %1113 }
 0x377   : > { %1281 = vst.msk [vmem:[#allocation5 + $0x18] sm:$0xff] %vm1277_vm6, %v1260_v2 }
 0x378   : > { %1134 = vst.msk [vmem:[#allocation5 + $0x20] sm:$0xff] %vm1129_vm3, %v1114_v3 }
 0x37a   : > { %v1309_v4 = vpop.permute.xlu1 %1308  ;;  %v1163_v5 = vpop.permute.xlu0 %1162 }
 0x37b   : > { %1330 = vst.msk [vmem:[#allocation5 + $0x18] sm:$0xff] %vm1326_vm7, %v1309_v4 }
 0x37c   : > { %1183 = vst.msk [vmem:[#allocation5 + $0x20] sm:$0xff] %vm1178_vm4, %v1163_v5 }
 0x37e   : > { %v1018_v6 = vpop.permute.xlu1 %1017  ;;  %v1212_v7 = vpop.permute.xlu0 %1211 }
 0x37f   : > { %1037 = vst.msk [vmem:[#allocation5 + $0x28] sm:$0xff] %vm1031_vm0, %v1018_v6 }
 0x380   : > { %1232 = vst.msk [vmem:[#allocation5 + $0x20] sm:$0xff] %vm1227_vm5, %v1212_v7 }
 0x382   : > { %v1358_v8 = vpop.permute.xlu1 %1357  ;;  %v1266_v9 = vpop.permute.xlu0 %1265 }
 0x383   : > { %1379 = vst.msk [vmem:[#allocation5 + $0x18] sm:$0xff] %vm1375_vm8, %v1358_v8 }
 0x386   : > { %v1067_v10 = vpop.permute.xlu1 %1066  ;;  %v1315_v11 = vpop.permute.xlu0 %1314 }
 0x387   : > { %1086 = vst.msk [vmem:[#allocation5 + $0x28] sm:$0xff] %vm1080_vm1, %v1067_v10 }
 0x38a   : > { %v1120_v12 = vpop.permute.xlu1 %1119  ;;  %v1020_v15 = vpop.permute.xlu0 %1019  ;;  %v1387_v17 = vld [vmem:[#allocation5 + $0x18] sm:$0xff] }
 0x38b   : > { %1137 = vst.msk [vmem:[#allocation5 + $0x38] sm:$0xff] %vm1129_vm3, %v1120_v12  ;;  %v1393_v13 = vpack.c.bf16 %v1387_v17, %v1386_v16 }
 0x38c   : > { %1038 = vst.msk [vmem:[#allocation5 + $0x30] sm:$0xff] %vm1031_vm0, %v1020_v15 }
 0x38d   : > { %1753 = vmatmul.mubr.msk.bf16.vlgmr.msra.gmra.mrb[0].mxu1 %vm1439_vm9, %v1393_v13 }
 0x38e   : > { %v1169_v14 = vpop.permute.xlu1 %1168  ;;  %v1069_v18 = vpop.permute.xlu0 %1068 }
 0x38f   : > { %1186 = vst.msk [vmem:[#allocation5 + $0x38] sm:$0xff] %vm1178_vm4, %v1169_v14 }
 0x390   : > { %1087 = vst.msk [vmem:[#allocation5 + $0x30] sm:$0xff] %vm1080_vm1, %v1069_v18 }
 0x391   : > { %1136 = vst.msk [vmem:[#allocation5 + $0x30] sm:$0xff] %vm1129_vm3, %v1118_v57 }
 0x392   : > { %1185 = vst.msk [vmem:[#allocation5 + $0x30] sm:$0xff] %vm1178_vm4, %v1167_v59  ;;  %v1218_v19 = vpop.permute.xlu1 %1217  ;;  %v1262_v20 = vpop.permute.xlu0 %1261 }
 0x393   : > { %1234 = vst.msk [vmem:[#allocation5 + $0x30] sm:$0xff] %vm1227_vm5, %v1216_v1  ;;  %1235 = vst.msk [vmem:[#allocation5 + $0x38] sm:$0xff] %vm1227_vm5, %v1218_v19 }
 0x394   : > { %1284 = vst.msk [vmem:[#allocation5 + $0x30] sm:$0xff] %vm1277_vm6, %v1266_v9  ;;  %1282 = vst.msk [vmem:[#allocation5 + $0x20] sm:$0xff] %vm1277_vm6, %v1262_v20 }
 0x395   : > { %1285 = vst.msk [vmem:[#allocation5 + $0x38] sm:$0xff] %vm1277_vm6, %v2738_v22 }
 0x396   : > { %1333 = vst.msk [vmem:[#allocation5 + $0x30] sm:$0xff] %vm1326_vm7, %v1315_v11  ;;  %1334 = vst.msk [vmem:[#allocation5 + $0x38] sm:$0xff] %vm1326_vm7, %v2744_v24  ;;  %v1116_v21 = vpop.permute.xlu1 %1115  ;;  %v1311_v23 = vpop.permute.xlu0 %1310 }
 0x397   : > { %1135 = vst.msk [vmem:[#allocation5 + $0x28] sm:$0xff] %vm1129_vm3, %v1116_v21 }
 0x398   : > { %1331 = vst.msk [vmem:[#allocation5 + $0x20] sm:$0xff] %vm1326_vm7, %v1311_v23 }
 0x39a   : > { %v1165_v25 = vpop.permute.xlu1 %1164  ;;  %v1360_v26 = vpop.permute.xlu0 %1359 }
 0x39b   : > { %1184 = vst.msk [vmem:[#allocation5 + $0x28] sm:$0xff] %vm1178_vm4, %v1165_v25 }
 0x39c   : > { %1380 = vst.msk [vmem:[#allocation5 + $0x20] sm:$0xff] %vm1375_vm8, %v1360_v26 }
 0x39e   : > { %v1214_v27 = vpop.permute.xlu1 %1213  ;;  %v1364_v28 = vpop.permute.xlu0 %1363 }
 0x39f   : > { %1233 = vst.msk [vmem:[#allocation5 + $0x28] sm:$0xff] %vm1227_vm5, %v1214_v27 }
 0x3a0   : > { %1382 = vst.msk [vmem:[#allocation5 + $0x30] sm:$0xff] %vm1375_vm8, %v1364_v28 }
 0x3a1   : > { %1283 = vst.msk [vmem:[#allocation5 + $0x28] sm:$0xff] %vm1277_vm6, %v2782_v56 }
 0x3a2   : > { %1332 = vst.msk [vmem:[#allocation5 + $0x28] sm:$0xff] %vm1326_vm7, %v2784_v58  ;;  %v1366_v22 = vpop.permute.xlu1 %1365 }
 0x3a3   : > { %1381 = vst.msk [vmem:[#allocation5 + $0x28] sm:$0xff] %vm1375_vm8, %v1362_v63  ;;  %1383 = vst.msk [vmem:[#allocation5 + $0x38] sm:$0xff] %vm1375_vm8, %v1366_v22  ;;  %v1388_v24 = vld [vmem:[#allocation5 + $0x20] sm:$0xff] }
 0x3a7   : > { %v1390_v0 = vld [vmem:[#allocation5 + $0x30] sm:$0xff] }
 0x3aa   : > { %v1389_v29 = vld [vmem:[#allocation5 + $0x28] sm:$0xff]  ;;  %v1391_v31 = vld [vmem:[#allocation5 + $0x38] sm:$0xff] }
 0x3ab   : > { %v1394_v30 = vpack.c.bf16 %v1389_v29, %v1388_v24  ;;  %v1395_v32 = vpack.c.bf16 %v1391_v31, %v1390_v0 }
 0x3ad   : > { %1756 = vmatprep.mubr.msk.bf16.mxu1 %vm1439_vm9, %v1394_v30 }
 0x3ae   : > { %1757 = vmatmul.mubr.msk.bf16.gmra.mrb[4].mxu1 %vm1439_vm9, %v1395_v32 }
 0x460   : > { %v1754_v34 = vpop.f32.mrb[0].mxu1 }
 0x461   : > { %v1499_v35 = vadd.f32 %v1754_v34, %v1695_v33  ;;  %v1490_v36 = vpop.f32.mrb[1].mxu1 }
 0x462   : > { %v1491_v37 = vadd.f32 %v1695_v33, %v1490_v36  ;;  %v1755_v38 = vpop.f32.mrb[2].mxu1 }
 0x463   : > { %v1523_v39 = vmax.f32 %v1499_v35, 0.0  ;;  %v1502_v40 = vadd.f32 %v1755_v38, %v1695_v33  ;;  %v1493_v41 = vpop.f32.mrb[3].mxu1 }
 0x464   : > { %v1521_v42 = vmax.f32 %v1491_v37, 0.0  ;;  %v1494_v43 = vadd.f32 %v1695_v33, %v1493_v41 }
 0x465   : > { %1531 = vst.msk [vmem:[%s296_s17 + $0x10] sm:$0xff] %vm938_vm13, %v1523_v39  ;;  %v1524_v44 = vmax.f32 %v1502_v40, 0.0 }
 0x466   : > { %1529 = vst.msk [vmem:[%s296_s17] sm:$0xff] %vm938_vm13, %v1521_v42  ;;  %v1522_v45 = vmax.f32 %v1494_v43, 0.0 }
 0x467   : > { %1532 = vst.msk [vmem:[%s296_s17 + $0x18] sm:$0xff] %vm938_vm13, %v1524_v44 }
 0x468   : > { %1530 = vst.msk [vmem:[%s296_s17 + $0x8] sm:$0xff] %vm938_vm13, %v1522_v45 }
 0x481   : > { %v1758_v46 = vpop.f32.mrb[4].mxu1 }
 0x482   : > { %v1515_v47 = vadd.f32 %v1758_v46, %v1695_v33  ;;  %v1506_v48 = vpop.f32.mrb[5].mxu1 }
 0x483   : > { %v1507_v49 = vadd.f32 %v1695_v33, %v1506_v48  ;;  %v1759_v50 = vpop.f32.mrb[6].mxu1 }
 0x484   : > { %v1527_v51 = vmax.f32 %v1515_v47, 0.0  ;;  %v1518_v52 = vadd.f32 %v1759_v50, %v1695_v33  ;;  %v1509_v53 = vpop.f32.mrb[7].mxu1 }
 0x485   : > { %v1525_v54 = vmax.f32 %v1507_v49, 0.0  ;;  %v1510_v55 = vadd.f32 %v1695_v33, %v1509_v53 }
 0x486   : > { %1535 = vst.msk [vmem:[%s296_s17 + $0x30] sm:$0xff] %vm938_vm13, %v1527_v51  ;;  %v1528_v56 = vmax.f32 %v1518_v52, 0.0 }
 0x487   : > { %1533 = vst.msk [vmem:[%s296_s17 + $0x20] sm:$0xff] %vm938_vm13, %v1525_v54  ;;  %v1526_v57 = vmax.f32 %v1510_v55, 0.0 }
 0x488   : > { %1536 = vst.msk [vmem:[%s296_s17 + $0x38] sm:$0xff] %vm938_vm13, %v1528_v56 }
 0x489   : > { %1534 = vst.msk [vmem:[%s296_s17 + $0x28] sm:$0xff] %vm938_vm13, %v1526_v57 }
 0x48a   : > { %2031 = shalt.err (!%p2028_p13)
}
 0x48b   : > { %s2032_s16 = scalar_lea.hbm %s2835_s15, 1024  ;;  %s2036_s7 = scalar_lea.hbm %s2890_s5, 2048 }
 0x48c   : > { %p2033_p9 = scmp.ne.s32.totalorder %s2835_s15, %s2032_s16  ;;  %p2037_p6 = scmp.lt.u32.totalorder %s2835_s15, %s2890_s5 }
 0x48d   : > { %p2038_p4 = scmp.lt.u32.totalorder %s2036_s7, %s2032_s16  ;;  %p2040_p3 = scmp.lt.u32.totalorder %s2032_s16, %s2835_s15 }
 0x48e   : > { %p2034_p0 = pnand %p2033_p9, %p2308_p10 }
 0x48f   : > { %p2039_p8 = por %p2038_p4, %p2037_p6 }
 0x490   : > { %p2035_p11 = pneg %p2034_p0 }
 0x491   : > { %p2041_p5 = por %p2040_p3, %p2039_p8 }
 0x493   : > { %p2042_p7 = pnand %p2041_p5, %p2035_p11 }
 0x495   : > { %2045 = shalt.err (!%p2042_p7)
}
 0x496   : > { %s2118_s11 = smov 128  }
 0x497   : > { %1780 = dma.vmem_to_hbm [thread:$0]  (%p2308_p10), %s2838_s26, 1024, %s2835_s15, %s1538_s22, %s2118_s11, %s2118_s11, %s2107_s13  }
 0x498 PF: > { %s1566_s8 = sand.u32 1, %s2080_s18   ;;  %p2908_p12 = scmp.ne.s32.totalorder %s2895_s25, 0 }
 0x499   : > { %p2909_p2 = scmp.ge.s32.totalorder %s2092_s21, 2  ;;  %s1567_s30 = scalar_lea.sflag [#allocation8], %s1566_s8 }
 0x49b   : > { %p1800_p1 = pnand %p2909_p2, %p2908_p12 }
 0x49d   : > { %2075 = dma.done.wait (!%p1800_p1), %s1567_s30, 1024  }
 0x49e   : > { %2077 = vsyncadd (!%p1800_p1), %s1567_s30, 4294966272  ;;  %p20_p13 = scmp.ge.s32.totalorder %s2298_s14, 4   ;;  %s2910_s18 = smov %s2084_s19 }
 0x49f   : > { %s2911_s19 = smov %s2088_s20  ;;  %s2912_s20 = smov %s2314_s28 }
 0x4a0   : > { %s2913_s21 = smov %s2298_s14  ;;  %22 = sbr.rel (!%p20_p13) target bundleno = 7 (0x7), region = 108 }
 0x4a7   :  { %1572 = vsyncpa [#allocation7], 1 }
 0x4a8   :  { %1574 = vsyncpa [#allocation7 + $0x1], 1 }
 0x4a9   :  { %1575 = vsyncpa [#allocation10], 1 }
 0x4aa   :  { %1576 = vsyncpa [#allocation13], 1 }
 0x4ab   :  { %1577 = vsyncpa [#allocation8], 1 }
 0x4ac   :  { %1579 = vsyncpa [#allocation8 + $0x1], 1 }

</bundles_post_ra>
